<compile_context>
chip_gen: v7x
topology: tpu7x:2x2x1
jax: 0.10.0
libtpu: 0.0.40
codegen_flags: <defaults>
</compile_context>

<pallas_src>
import functools

import jax
import jax.numpy as jnp
from jax.experimental import pallas as pl
from jax.experimental.pallas import tpu as pltpu

NEG_SLOPE = (1.0 / 8.0 + 1.0 / 3.0) / 2.0   # nn.RReLU eval-mode slope
LN_EPS = 1e-5
MAX_TILE = 2048                              # edge rows per grid step (upper bound)
_ONEHOT_VMEM_BUDGET = 16 * 1024 * 1024       # cap for per-step one-hot temporaries


def _act(x):
    # RReLU in eval mode == LeakyReLU with slope (lower+upper)/2
    return jnp.where(x >= 0, x, x * NEG_SLOPE)


def _sigmoid(x):
    # numerically stable sigmoid via EUP tanh
    return 0.5 * (jnp.tanh(0.5 * x) + 1.0)


def _layer_norm(y, g, b):
    mean = jnp.mean(y, axis=-1, keepdims=True)
    var = jnp.mean(jnp.square(y - mean), axis=-1, keepdims=True)
    return (y - mean) * jax.lax.rsqrt(var + LN_EPS) * g + b


def _round_up(n, m):
    return ((n + m - 1) // m) * m


def _edge_tiling(n_edges, max_table_rows):
    """Pick (padded_E, tile, steps) for the edge grid.

    Keeps ~4 one-hot f32 temporaries of [tile, max_table_rows] inside a VMEM
    budget and bounds padding waste at ~25%.
    """
    cap = _ONEHOT_VMEM_BUDGET // max(1, 16 * max_table_rows)
    cap = max(128, min(MAX_TILE, cap))
    if n_edges <= cap:
        pe = _round_up(max(n_edges, 1), 8)
        return pe, pe, 1
    for t in (2048, 1024, 512, 256, 128):
        if t > cap:
            continue
        pe = _round_up(n_edges, t)
        if (pe - n_edges) * 4 <= pe:          # accept <= 25% padding waste
            return pe, t, pe // t
    pe = _round_up(n_edges, 128)
    return pe, 128, pe // 128


def _whole(a):
    # whole-array (un-blocked) VMEM input, constant across the edge grid
    return pl.BlockSpec(a.shape, lambda i: (0, 0))


_ARBITRARY = pltpu.CompilerParams(dimension_semantics=("arbitrary",))
_PARALLEL = pltpu.CompilerParams(dimension_semantics=("parallel",))


def _onehot_gather(idx_col, table, n_rows_tile):
    """gathered[e, :] = table[idx[e], :]   (all-zero row when idx[e] == -1)."""
    ntab = table.shape[0]
    iota = jax.lax.broadcasted_iota(jnp.int32, (n_rows_tile, ntab), 1)
    oh = (idx_col == iota).astype(jnp.float32)
    return jnp.dot(oh, table, preferred_element_type=jnp.float32)


# ----------------------------------------------------------------------------
# Kernel A: fused entity layer
#   gather(src/etype/eq) -> message + sigmoid gate + deg^-1[src] scale
#   -> scatter_add over dst (accumulator output) -> * deg^-1[dst]
#   -> ent_transfer linear + act + LayerNorm   (finalize on last grid step)
# ----------------------------------------------------------------------------
def _ent_layer_kernel(gidx_ref, dsts_ref, tn_ref, tr_ref, tq_ref, d2_ref,
                      bm_ref, ba_ref, w_ref, b_ref, g_ref, bt_ref,
                      out_ref, *, H):
    step = pl.program_id(0)

    @pl.when(step == 0)
    def _():
        out_ref[...] = jnp.zeros_like(out_ref)

    idx = gidx_ref[...]                       # [T, 4] int32: src, etype, eq, -
    T = idx.shape[0]
    n_node = tn_ref.shape[0]

    gh = _onehot_gather(idx[:, 0:1], tn_ref[...], T)   # [T, H+1] (col H = deg_inv^2[src])
    gr = _onehot_gather(idx[:, 1:2], tr_ref[...], T)   # [T, H+1] (col H = <act(r), wa_r>)
    gq = _onehot_gather(idx[:, 2:3], tq_ref[...], T)   # [T, H+1] (col H = <act(q), wa_q>)

    msg = _act(gh[:, :H] + gr[:, :H] + gq[:, :H] + bm_ref[...])
    gate = _sigmoid(gr[:, H:H + 1] + gq[:, H:H + 1] + ba_ref[...])
    scaled = msg * (gate * gh[:, H:H + 1])             # padded edges -> scale 0

    dst = dsts_ref[...]                                 # [1, T] int32 (-1 for padding)
    iota_n = jax.lax.broadcasted_iota(jnp.int32, (n_node, T), 0)
    oh_s = (dst == iota_n).astype(jnp.float32)          # [n_node, T]
    out_ref[...] += jnp.dot(oh_s, scaled, preferred_element_type=jnp.float32)

    @pl.when(step == pl.num_programs(0) - 1)
    def _():
        agg = out_ref[...] * d2_ref[...]                 # post-scatter deg_inv^2[dst]
        y = _act(jnp.dot(agg, w_ref[...], preferred_element_type=jnp.float32)
                 + b_ref[...])
        out_ref[...] = _layer_norm(y, g_ref[...], bt_ref[...])


# ----------------------------------------------------------------------------
# Kernel B: fused relation layer
#   gather(src/dst/eq/etype) -> message + sigmoid gate
#   -> scatter_add over etype -> rel_transfer linear + act + residual + LayerNorm
# ----------------------------------------------------------------------------
def _rel_layer_kernel(gidx_ref, ets_ref, th_ref, tt_ref, tq_ref, br_ref, old_ref,
                      bm_ref, bb_ref, w_ref, b_ref, g_ref, bt_ref,
                      out_ref, *, H):
    step = pl.program_id(0)

    @pl.when(step == 0)
    def _():
        out_ref[...] = jnp.zeros_like(out_ref)

    idx = gidx_ref[...]                       # [T, 4] int32: src, dst, eq, etype
    T = idx.shape[0]
    n_rel = tq_ref.shape[0]

    gh = _onehot_gather(idx[:, 0:1], th_ref[...], T)    # [T, H]
    gt = _onehot_gather(idx[:, 1:2], tt_ref[...], T)    # [T, H]
    gq = _onehot_gather(idx[:, 2:3], tq_ref[...], T)    # [T, H+1] (col H = <q, wb_q>)
    gbr = _onehot_gather(idx[:, 3:4], br_ref[...], T)   # [T, 8]   (col 0 = <r, wb_r>)

    msg = _act(gh + gt + gq[:, :H] + bm_ref[...])
    gate = _sigmoid(gbr[:, 0:1] + gq[:, H:H + 1] + bb_ref[...])
    scaled = msg * gate

    et = ets_ref[...]                                    # [1, T] (-1 for padding)
    iota_r = jax.lax.broadcasted_iota(jnp.int32, (n_rel, T), 0)
    oh_s = (et == iota_r).astype(jnp.float32)
    out_ref[...] += jnp.dot(oh_s, scaled, preferred_element_type=jnp.float32)

    @pl.when(step == pl.num_programs(0) - 1)
    def _():
        y = _act(jnp.dot(out_ref[...], w_ref[...],
                         preferred_element_type=jnp.float32) + b_ref[...]) + old_ref[...]
        out_ref[...] = _layer_norm(y, g_ref[...], bt_ref[...])


# ----------------------------------------------------------------------------
# Kernel C: transfer + LayerNorm for the final projection (row tiled)
# ----------------------------------------------------------------------------
def _transfer_ln_kernel(x_ref, w_ref, b_ref, g_ref, bt_ref, out_ref):
    y = _act(jnp.dot(x_ref[...], w_ref[...], preferred_element_type=jnp.float32)
             + b_ref[...])
    out_ref[...] = _layer_norm(y, g_ref[...], bt_ref[...])


# ----------------------------------------------------------------------------
# pallas_call wrappers
# ----------------------------------------------------------------------------
def ent_layer(gidx, dst_row, tn, tr, tq, d2col, bm, ba, w, b, g, bt, *,
              tile, steps, H):
    n_node = tn.shape[0]
    pe = gidx.shape[0]
    cost = pl.CostEstimate(
        flops=int(2 * pe * ((tn.shape[0] + 2 * tr.shape[0]) * (H + 1) + n_node * H)),
        transcendentals=int(pe),
        bytes_accessed=int(4 * (gidx.size + dst_row.size + tn.size + tr.size
                                + tq.size + 2 * n_node * H)),
    )
    return pl.pallas_call(
        functools.partial(_ent_layer_kernel, H=H),
        out_shape=jax.ShapeDtypeStruct((n_node, H), jnp.float32),
        grid=(steps,),
        in_specs=[pl.BlockSpec((tile, 4), lambda i: (i, 0)),
                  pl.BlockSpec((1, tile), lambda i: (0, i)),
                  _whole(tn), _whole(tr), _whole(tq), _whole(d2col),
                  _whole(bm), _whole(ba), _whole(w), _whole(b),
                  _whole(g), _whole(bt)],
        out_specs=pl.BlockSpec((n_node, H), lambda i: (0, 0)),
        compiler_params=_ARBITRARY,
        cost_estimate=cost,
    )(gidx, dst_row, tn, tr, tq, d2col, bm, ba, w, b, g, bt)


def rel_layer(gidx, et_row, th, tt, tq, br, old, bm, bb, w, b, g, bt, *,
              tile, steps, H):
    n_rel = tq.shape[0]
    pe = gidx.shape[0]
    cost = pl.CostEstimate(
        flops=int(2 * pe * ((2 * th.shape[0] + 2 * n_rel) * (H + 1) + n_rel * H)),
        transcendentals=int(pe),
        bytes_accessed=int(4 * (gidx.size + et_row.size + th.size + tt.size
                                + tq.size + br.size + 2 * n_rel * H)),
    )
    return pl.pallas_call(
        functools.partial(_rel_layer_kernel, H=H),
        out_shape=jax.ShapeDtypeStruct((n_rel, H), jnp.float32),
        grid=(steps,),
        in_specs=[pl.BlockSpec((tile, 4), lambda i: (i, 0)),
                  pl.BlockSpec((1, tile), lambda i: (0, i)),
                  _whole(th), _whole(tt), _whole(tq), _whole(br), _whole(old),
                  _whole(bm), _whole(bb), _whole(w), _whole(b),
                  _whole(g), _whole(bt)],
        out_specs=pl.BlockSpec((n_rel, H), lambda i: (0, 0)),
        compiler_params=_ARBITRARY,
        cost_estimate=cost,
    )(gidx, et_row, th, tt, tq, br, old, bm, bb, w, b, g, bt)


def transfer_ln(x, w, b, g, bt):
    n, din = x.shape
    H = w.shape[1]
    if n <= MAX_TILE:
        tile, steps = _round_up(n, 8), 1
    else:
        tile = MAX_TILE
        steps = -(-n // tile)
    pn = tile * steps
    if pn > n:
        x = jnp.pad(x, ((0, pn - n), (0, 0)))
    out = pl.pallas_call(
        _transfer_ln_kernel,
        out_shape=jax.ShapeDtypeStruct((pn, H), jnp.float32),
        grid=(steps,),
        in_specs=[pl.BlockSpec((tile, din), lambda i: (i, 0)),
                  _whole(w), _whole(b), _whole(g), _whole(bt)],
        out_specs=pl.BlockSpec((tile, H), lambda i: (i, 0)),
        compiler_params=_PARALLEL,
    )(x, w, b, g, bt)
    return out[:n]


# ----------------------------------------------------------------------------
# Deterministic parameter init (synthetic; shapes from PromptEncoder.__init__)
# ----------------------------------------------------------------------------
def init_params(key, H, n_layer, path_hop):
    keys = iter(jax.random.split(key, 128))

    def nrm(shape, scale=0.1):
        return jax.random.normal(next(keys), shape, jnp.float32) * scale

    def linear(din, dout):
        return {'w': nrm((din, dout)), 'b': nrm((1, dout))}

    p = {}
    p['start_rel'] = nrm((1, H))                                  # Embedding(1, H)
    p['pos_emb'] = nrm(((path_hop + 1) ** 2, H))                  # Embedding((P+1)^2, H)
    p['self_loop'] = nrm((1, H))                                  # Embedding(1, H)
    p['W_ht2r'] = [linear(3 * H, H) for _ in range(n_layer)]
    p['W_message'] = [linear(3 * H, H) for _ in range(n_layer)]   # MSG == 'concat'
    p['alpha'] = [linear(2 * H, 1) for _ in range(n_layer)]
    p['beta'] = [linear(2 * H, 1) for _ in range(n_layer)]
    p['loop_transfer'] = [linear(2 * H, H) for _ in range(n_layer)]
    p['ent_transfer'] = [linear(H, H) for _ in range(n_layer)]
    p['rel_transfer'] = [linear(H, H) for _ in range(n_layer)]
    p['final'] = linear(n_layer * H, H)
    ln = lambda: {'g': jnp.ones((1, H), jnp.float32), 'b': jnp.zeros((1, H), jnp.float32)}
    p['ln_rels'] = [ln() for _ in range(n_layer + 1)]
    p['ln_ents'] = [ln() for _ in range(n_layer + 1)]
    p['ln_loop'] = [ln() for _ in range(n_layer + 1)]
    return p


# ----------------------------------------------------------------------------
# Full forward
# ----------------------------------------------------------------------------
def prompt_encoder_forward(params, edge_index, edge_type, h_positions, t_positions,
                           query_relations, edge_query_relations, labels, num_ent,
                           relation_num, shot, path_hop, n_layer, H):
    Q = h_positions.shape[-1]
    R = relation_num
    RQ = R * Q
    E = edge_index.shape[1]

    P_N = _round_up(num_ent, 8)
    P_RQ = _round_up(RQ, 8)
    P_E, tile, steps = _edge_tiling(E, max(P_N, P_RQ))

    src = edge_index[0].astype(jnp.int32)
    dst = edge_index[1].astype(jnp.int32)
    etype = edge_type.astype(jnp.int32)
    eq = edge_query_relations.astype(jnp.int32)

    def pad_idx(a):
        # padded edges carry -1 -> their one-hot gather/scatter rows are all zero
        return jnp.pad(a, (0, P_E - E), constant_values=-1) if P_E > E else a

    src_p, dst_p, et_p, eq_p = pad_idx(src), pad_idx(dst), pad_idx(etype), pad_idx(eq)

    # packed per-edge index streams (one [P_E,4] gather pack + one [1,P_E] scatter row)
    zero_col = jnp.zeros_like(src_p)
    ent_gidx = jnp.stack([src_p, et_p, eq_p, zero_col], axis=-1)   # [P_E, 4]
    rel_gidx = jnp.stack([src_p, dst_p, eq_p, et_p], axis=-1)      # [P_E, 4]
    ent_scat = dst_p[None, :]                                      # [1, P_E]
    rel_scat = et_p[None, :]                                       # [1, P_E]

    # ---- USE_TOKEN_SET initialization ----
    position = (labels[:, 0] * (path_hop + 1) + labels[:, 1]).astype(jnp.int32)
    if P_N > num_ent:
        position = jnp.pad(position, (0, P_N - num_ent))
    node_emb = jnp.take(params['pos_emb'], position, axis=0)       # [P_N, H]
    node_emb = node_emb.at[h_positions].set(params['pos_emb'][0])
    node_emb = node_emb.at[t_positions].set(params['pos_emb'][1])

    rel_emb = jnp.zeros((P_RQ, H), jnp.float32)
    q_idx = (query_relations
             + jnp.arange(Q, dtype=query_relations.dtype) * R).astype(jnp.int32)
    rel_emb = rel_emb.at[q_idx].set(params['start_rel'][0])

    self_loop = jnp.broadcast_to(params['self_loop'], (Q, H)).astype(jnp.float32)

    # ---- compute_norm (identical every layer; applied twice in the reference) ----
    deg = jax.ops.segment_sum(jnp.ones((E,), jnp.float32), dst, num_segments=P_N)
    d2 = jnp.where(deg > 0, 1.0 / deg, 0.0)                        # deg_inv ** 2
    d2col = d2[:, None]                                            # [P_N, 1]

    finals = []
    for i in range(n_layer):
        # --- entity phase: table-level pre-transform (tiny, XLA), then fused kernel ---
        wm = params['W_message'][i]['w']           # [3H, H]  (concat order: h, r, q)
        wa = params['alpha'][i]['w']               # [2H, 1]  (concat order: r, q)
        act_rel = _act(rel_emb)
        tn = jnp.concatenate([node_emb @ wm[:H], d2col], axis=-1)               # [P_N, H+1]
        tr = jnp.concatenate([rel_emb @ wm[H:2 * H], act_rel @ wa[:H]], axis=-1)  # [P_RQ, H+1]
        tq = jnp.concatenate([rel_emb @ wm[2 * H:], act_rel @ wa[H:]], axis=-1)   # [P_RQ, H+1]
        node_emb = ent_layer(
            ent_gidx, ent_scat, tn, tr, tq, d2col,
            params['W_message'][i]['b'], params['alpha'][i]['b'],
            params['ent_transfer'][i]['w'], params['ent_transfer'][i]['b'],
            params['ln_ents'][i]['g'], params['ln_ents'][i]['b'],
            tile=tile, steps=steps, H=H)

        # --- relation phase ---
        wh = params['W_ht2r'][i]['w']              # [3H, H]  (concat order: h, t, q)
        wb = params['beta'][i]['w']                # [2H, 1]  (concat order: r, q)
        th = node_emb @ wh[:H]                                                   # [P_N, H]
        tt = node_emb @ wh[H:2 * H]                                              # [P_N, H]
        tq2 = jnp.concatenate([rel_emb @ wh[2 * H:], rel_emb @ wb[H:]], axis=-1)  # [P_RQ, H+1]
        br = jnp.pad(rel_emb @ wb[:H], ((0, 0), (0, 7)))                          # [P_RQ, 8]
        rel_emb = rel_layer(
            rel_gidx, rel_scat, th, tt, tq2, br, rel_emb,
            params['W_ht2r'][i]['b'], params['beta'][i]['b'],
            params['rel_transfer'][i]['w'], params['rel_transfer'][i]['b'],
            params['ln_rels'][i]['g'], params['ln_rels'][i]['b'],
            tile=tile, steps=steps, H=H)
        finals.append(rel_emb)

        # --- self-loop update: Q rows only -> plain XLA (a Pallas launch is pure overhead) ---
        qr = jnp.take(rel_emb, q_idx, axis=0)
        y = _act(jnp.concatenate([self_loop, qr], axis=-1)
                 @ params['loop_transfer'][i]['w'] + params['loop_transfer'][i]['b'])
        self_loop = _layer_norm(self_loop + y,
                                params['ln_loop'][i]['g'], params['ln_loop'][i]['b'])

    final_cat = jnp.concatenate(finals, axis=-1)                   # [P_RQ, n_layer*H]
    final = transfer_ln(final_cat, params['final']['w'], params['final']['b'],
                        params['ln_rels'][n_layer]['g'], params['ln_rels'][n_layer]['b'])
    final = final[:RQ]

    final_full = final.reshape(-1, shot, R, H)
    final_mean = jnp.mean(final_full, axis=1).reshape(-1, R, H)
    loop_mean = jnp.mean(self_loop.reshape(-1, shot, 1, H), axis=1).reshape(-1, 1, H)
    # Dropout(0.3) in eval mode == identity
    out = jnp.concatenate([final_mean, loop_mean], axis=1)         # [B, R+1, H]
    return out, None, final_full


if __name__ == "__main__":
    H = 32
    n_layer = 2
    path_hop = 2
    R = 3          # loader.kg.relation_num
    shot = 2
    B = 1
    Q = B * shot   # number of queries == h_positions.size(-1)
    num_ent = 10
    E = 16

    key = jax.random.PRNGKey(0)
    kp, k1, k2, k3, k4, k5 = jax.random.split(key, 6)
    params = init_params(kp, H, n_layer, path_hop)

    edge_index = jax.random.randint(k1, (2, E), 0, num_ent, dtype=jnp.int32)
    edge_type = jax.random.randint(k2, (E,), 0, R * Q, dtype=jnp.int32)
    edge_query_relations = jax.random.randint(k3, (E,), 0, R * Q, dtype=jnp.int32)
    h_positions = jnp.array([0, 1], dtype=jnp.int32)
    t_positions = jnp.array([2, 3], dtype=jnp.int32)
    query_relations = jax.random.randint(k4, (Q,), 0, R, dtype=jnp.int32)
    labels = jax.random.randint(k5, (num_ent, 2), 0, path_hop + 1, dtype=jnp.int32)

    fwd = jax.jit(
        prompt_encoder_forward,
        static_argnames=('num_ent', 'relation_num', 'shot', 'path_hop', 'n_layer', 'H'))

    out, _none, out_full = fwd(
        params, edge_index, edge_type, h_positions, t_positions, query_relations,
        edge_query_relations, labels, num_ent=num_ent, relation_num=R, shot=shot,
        path_hop=path_hop, n_layer=n_layer, H=H)

    jax.block_until_ready(out)
    jax.block_until_ready(out_full)
    assert out.shape == (B, R + 1, H), out.shape
    assert out_full.shape == (B, shot, R, H), out_full.shape
    assert bool(jnp.all(jnp.isfinite(out)))
    print("KERNEL_OK")
</pallas_src>

<mosaic_0001>
module attributes {stable_mosaic.version = 11 : i64} {
  func.func private @main(%arg0: i32) attributes {dimension_semantics = [#tpu.dimension_semantics<core_parallel>], iteration_bounds = array<i64: 2>, tpu.core_type = #tpu.core_type<sc_scalar_subcore>, window_params = []} {
    return
  }
}

module attributes {stable_mosaic.version = 11 : i64} {
  func.func private @main(%arg0: i32) attributes {dimension_semantics = [#tpu.dimension_semantics<core_parallel>], iteration_bounds = array<i64: 2>, tpu.core_type = #tpu.core_type<sc_scalar_subcore>, window_params = []} {
    return
  }
}

module attributes {stable_mosaic.version = 11 : i64} {
  func.func @_ent_layer_kernel(%arg0: i32, %arg1: memref<16x4xi32, #tpu.memory_space<vmem>>, %arg2: memref<1x16xi32, #tpu.memory_space<vmem>>, %arg3: memref<16x33xf32, #tpu.memory_space<vmem>>, %arg4: memref<8x33xf32, #tpu.memory_space<vmem>>, %arg5: memref<8x33xf32, #tpu.memory_space<vmem>>, %arg6: memref<16x1xf32, #tpu.memory_space<vmem>>, %arg7: memref<1x32xf32, #tpu.memory_space<vmem>>, %arg8: memref<1x1xf32, #tpu.memory_space<vmem>>, %arg9: memref<32x32xf32, #tpu.memory_space<vmem>>, %arg10: memref<1x32xf32, #tpu.memory_space<vmem>>, %arg11: memref<1x32xf32, #tpu.memory_space<vmem>>, %arg12: memref<1x32xf32, #tpu.memory_space<vmem>>, %arg13: memref<16x32xf32, #tpu.memory_space<vmem>>) attributes {dimension_semantics = [#tpu.dimension_semantics<arbitrary>], iteration_bounds = array<i64: 1>, scalar_prefetch = 0 : i64, scratch_operands = 0 : i64, tpu.core_type = #tpu.core_type<tc>, window_params = [{transform_indices = @transform_0, window_bounds = array<i64: 16, 4>}, {transform_indices = @transform_1, window_bounds = array<i64: 1, 16>}, {pipeline_mode = #tpu.pipeline_mode<synchronous>, transform_indices = @transform_2, window_bounds = array<i64: 16, 33>}, {pipeline_mode = #tpu.pipeline_mode<synchronous>, transform_indices = @transform_3, window_bounds = array<i64: 8, 33>}, {pipeline_mode = #tpu.pipeline_mode<synchronous>, transform_indices = @transform_4, window_bounds = array<i64: 8, 33>}, {pipeline_mode = #tpu.pipeline_mode<synchronous>, transform_indices = @transform_5, window_bounds = array<i64: 16, 1>}, {pipeline_mode = #tpu.pipeline_mode<synchronous>, transform_indices = @transform_6, window_bounds = array<i64: 1, 32>}, {pipeline_mode = #tpu.pipeline_mode<synchronous>, transform_indices = @transform_7, window_bounds = array<i64: 1, 1>}, {pipeline_mode = #tpu.pipeline_mode<synchronous>, transform_indices = @transform_8, window_bounds = array<i64: 32, 32>}, {pipeline_mode = #tpu.pipeline_mode<synchronous>, transform_indices = @transform_9, window_bounds = array<i64: 1, 32>}, {pipeline_mode = #tpu.pipeline_mode<synchronous>, transform_indices = @transform_10, window_bounds = array<i64: 1, 32>}, {pipeline_mode = #tpu.pipeline_mode<synchronous>, transform_indices = @transform_11, window_bounds = array<i64: 1, 32>}, {pipeline_mode = #tpu.pipeline_mode<synchronous>, transform_indices = @transform_12, window_bounds = array<i64: 16, 32>}]} {
    %c0_i32 = arith.constant 0 : i32
    %0 = arith.cmpi eq, %arg0, %c0_i32 : i32
    %1 = arith.extui %0 : i1 to i32
    %c0_i32_0 = arith.constant 0 : i32
    %2 = arith.cmpi ne, %1, %c0_i32_0 : i32
    scf.if %2 {
      %cst_28 = arith.constant 0.000000e+00 : f32
      %71 = vector.broadcast %cst_28 : f32 to vector<16x32xf32>
      %c0_29 = arith.constant 0 : index
      %c0_30 = arith.constant 0 : index
      %72 = vector.load %arg13[%c0_29, %c0_30] : memref<16x32xf32, #tpu.memory_space<vmem>>, vector<16x32xf32>
      tpu.vector_store %arg13[%c0_29, %c0_30], %71 {strides = array<i32>} : memref<16x32xf32, #tpu.memory_space<vmem>>, vector<16x32xf32>,
    } else {
    }
    %c0 = arith.constant 0 : index
    %c0_1 = arith.constant 0 : index
    %3 = vector.load %arg1[%c0, %c0_1] : memref<16x4xi32, #tpu.memory_space<vmem>>, vector<16x4xi32>
    %4 = vector.extract_strided_slice %3 {offsets = [0, 0], sizes = [16, 1], strides = [1, 1]} : vector<16x4xi32> to vector<16x1xi32>
    %c0_2 = arith.constant 0 : index
    %c0_3 = arith.constant 0 : index
    %5 = vector.load %arg3[%c0_2, %c0_3] : memref<16x33xf32, #tpu.memory_space<vmem>>, vector<16x33xf32>
    %6 = tpu.iota {dimensions = array<i32: 1>} : vector<16x16xi32>
    %7 = vector.broadcast %4 : vector<16x1xi32> to vector<16x16xi32>
    %8 = arith.cmpi eq, %7, %6 : vector<16x16xi32>
    %9 = arith.extui %8 : vector<16x16xi1> to vector<16x16xi32>
    %10 = arith.sitofp %9 : vector<16x16xi32> to vector<16x16xf32>
    %cst = arith.constant dense<0.000000e+00> : vector<16x33xf32>
    %11 = tpu.matmul %10, %5, %cst {dimension_numbers = #tpu.dot_dimension_numbers<[1], [0], [0], [1], [0, 0, 1, 1], [], []>} : vector<16x16xf32>, vector<16x33xf32>, vector<16x33xf32> -> vector<16x33xf32>
    %12 = vector.extract_strided_slice %3 {offsets = [0, 1], sizes = [16, 1], strides = [1, 1]} : vector<16x4xi32> to vector<16x1xi32>
    %c0_4 = arith.constant 0 : index
    %c0_5 = arith.constant 0 : index
    %13 = vector.load %arg4[%c0_4, %c0_5] : memref<8x33xf32, #tpu.memory_space<vmem>>, vector<8x33xf32>
    %14 = tpu.iota {dimensions = array<i32: 1>} : vector<16x8xi32>
    %15 = vector.broadcast %12 : vector<16x1xi32> to vector<16x8xi32>
    %16 = arith.cmpi eq, %15, %14 : vector<16x8xi32>
    %17 = arith.extui %16 : vector<16x8xi1> to vector<16x8xi32>
    %18 = arith.sitofp %17 : vector<16x8xi32> to vector<16x8xf32>
    %cst_6 = arith.constant dense<0.000000e+00> : vector<16x33xf32>
    %19 = tpu.matmul %18, %13, %cst_6 {dimension_numbers = #tpu.dot_dimension_numbers<[1], [0], [0], [1], [0, 0, 1, 1], [], []>} : vector<16x8xf32>, vector<8x33xf32>, vector<16x33xf32> -> vector<16x33xf32>
    %20 = vector.extract_strided_slice %3 {offsets = [0, 2], sizes = [16, 1], strides = [1, 1]} : vector<16x4xi32> to vector<16x1xi32>
    %c0_7 = arith.constant 0 : index
    %c0_8 = arith.constant 0 : index
    %21 = vector.load %arg5[%c0_7, %c0_8] : memref<8x33xf32, #tpu.memory_space<vmem>>, vector<8x33xf32>
    %22 = tpu.iota {dimensions = array<i32: 1>} : vector<16x8xi32>
    %23 = vector.broadcast %20 : vector<16x1xi32> to vector<16x8xi32>
    %24 = arith.cmpi eq, %23, %22 : vector<16x8xi32>
    %25 = arith.extui %24 : vector<16x8xi1> to vector<16x8xi32>
    %26 = arith.sitofp %25 : vector<16x8xi32> to vector<16x8xf32>
    %cst_9 = arith.constant dense<0.000000e+00> : vector<16x33xf32>
    %27 = tpu.matmul %26, %21, %cst_9 {dimension_numbers = #tpu.dot_dimension_numbers<[1], [0], [0], [1], [0, 0, 1, 1], [], []>} : vector<16x8xf32>, vector<8x33xf32>, vector<16x33xf32> -> vector<16x33xf32>
    %28 = vector.extract_strided_slice %11 {offsets = [0, 0], sizes = [16, 32], strides = [1, 1]} : vector<16x33xf32> to vector<16x32xf32>
    %29 = vector.extract_strided_slice %19 {offsets = [0, 0], sizes = [16, 32], strides = [1, 1]} : vector<16x33xf32> to vector<16x32xf32>
    %30 = arith.addf %28, %29 : vector<16x32xf32>
    %31 = vector.extract_strided_slice %27 {offsets = [0, 0], sizes = [16, 32], strides = [1, 1]} : vector<16x33xf32> to vector<16x32xf32>
    %32 = arith.addf %30, %31 : vector<16x32xf32>
    %c0_10 = arith.constant 0 : index
    %c0_11 = arith.constant 0 : index
    %33 = vector.load %arg7[%c0_10, %c0_11] : memref<1x32xf32, #tpu.memory_space<vmem>>, vector<1x32xf32>
    %34 = vector.broadcast %33 : vector<1x32xf32> to vector<16x32xf32>
    %35 = arith.addf %32, %34 : vector<16x32xf32>
    %cst_12 = arith.constant 0.000000e+00 : f32
    %36 = vector.broadcast %cst_12 : f32 to vector<16x32xf32>
    %37 = arith.cmpf oge, %35, %36 : vector<16x32xf32>
    %cst_13 = arith.constant 0.229166672 : f32
    %38 = vector.broadcast %cst_13 : f32 to vector<16x32xf32>
    %39 = arith.mulf %35, %38 : vector<16x32xf32>
    %40 = arith.select %37, %35, %39 : vector<16x32xi1>, vector<16x32xf32>
    %41 = vector.extract_strided_slice %19 {offsets = [0, 32], sizes = [16, 1], strides = [1, 1]} : vector<16x33xf32> to vector<16x1xf32>
    %42 = vector.extract_strided_slice %27 {offsets = [0, 32], sizes = [16, 1], strides = [1, 1]} : vector<16x33xf32> to vector<16x1xf32>
    %43 = arith.addf %41, %42 : vector<16x1xf32>
    %c0_14 = arith.constant 0 : index
    %c0_15 = arith.constant 0 : index
    %44 = vector.load %arg8[%c0_14, %c0_15] : memref<1x1xf32, #tpu.memory_space<vmem>>, vector<1x1xf32>
    %45 = vector.broadcast %44 : vector<1x1xf32> to vector<16x1xf32>
    %46 = arith.addf %43, %45 : vector<16x1xf32>
    %cst_16 = arith.constant 5.000000e-01 : f32
    %47 = vector.broadcast %cst_16 : f32 to vector<16x1xf32>
    %48 = arith.mulf %47, %46 : vector<16x1xf32>
    %49 = math.tanh %48 : vector<16x1xf32>
    %cst_17 = arith.constant 1.000000e+00 : f32
    %50 = vector.broadcast %cst_17 : f32 to vector<16x1xf32>
    %51 = arith.addf %49, %50 : vector<16x1xf32>
    %cst_18 = arith.constant 5.000000e-01 : f32
    %52 = vector.broadcast %cst_18 : f32 to vector<16x1xf32>
    %53 = arith.mulf %52, %51 : vector<16x1xf32>
    %54 = vector.extract_strided_slice %11 {offsets = [0, 32], sizes = [16, 1], strides = [1, 1]} : vector<16x33xf32> to vector<16x1xf32>
    %55 = arith.mulf %53, %54 : vector<16x1xf32>
    %56 = vector.broadcast %55 : vector<16x1xf32> to vector<16x32xf32>
    %57 = arith.mulf %40, %56 : vector<16x32xf32>
    %c0_19 = arith.constant 0 : index
    %c0_20 = arith.constant 0 : index
    %58 = vector.load %arg2[%c0_19, %c0_20] : memref<1x16xi32, #tpu.memory_space<vmem>>, vector<1x16xi32>
    %59 = tpu.iota {dimensions = array<i32: 0>} : vector<16x16xi32>
    %60 = vector.broadcast %58 : vector<1x16xi32> to vector<16x16xi32>
    %61 = arith.cmpi eq, %60, %59 : vector<16x16xi32>
    %62 = arith.extui %61 : vector<16x16xi1> to vector<16x16xi32>
    %63 = arith.sitofp %62 : vector<16x16xi32> to vector<16x16xf32>
    %c0_21 = arith.constant 0 : index
    %c0_22 = arith.constant 0 : index
    %64 = vector.load %arg13[%c0_21, %c0_22] : memref<16x32xf32, #tpu.memory_space<vmem>>, vector<16x32xf32>
    %cst_23 = arith.constant dense<0.000000e+00> : vector<16x32xf32>
    %65 = tpu.matmul %63, %57, %cst_23 {dimension_numbers = #tpu.dot_dimension_numbers<[1], [0], [0], [1], [0, 0, 1, 1], [], []>} : vector<16x16xf32>, vector<16x32xf32>, vector<16x32xf32> -> vector<16x32xf32>
    %66 = arith.addf %64, %65 : vector<16x32xf32>
    %c0_24 = arith.constant 0 : index
    %c0_25 = arith.constant 0 : index
    %67 = vector.load %arg13[%c0_24, %c0_25] : memref<16x32xf32, #tpu.memory_space<vmem>>, vector<16x32xf32>
    tpu.vector_store %arg13[%c0_24, %c0_25], %66 {strides = array<i32>} : memref<16x32xf32, #tpu.memory_space<vmem>>, vector<16x32xf32>,
    %c0_i32_26 = arith.constant 0 : i32
    %68 = arith.cmpi eq, %arg0, %c0_i32_26 : i32
    %69 = arith.extui %68 : i1 to i32
    %c0_i32_27 = arith.constant 0 : i32
    %70 = arith.cmpi ne, %69, %c0_i32_27 : i32
    scf.if %70 {
      %c0_28 = arith.constant 0 : index
      %c0_29 = arith.constant 0 : index
      %71 = vector.load %arg13[%c0_28, %c0_29] : memref<16x32xf32, #tpu.memory_space<vmem>>, vector<16x32xf32>
      %c0_30 = arith.constant 0 : index
      %c0_31 = arith.constant 0 : index
      %72 = vector.load %arg6[%c0_30, %c0_31] : memref<16x1xf32, #tpu.memory_space<vmem>>, vector<16x1xf32>
      %73 = vector.broadcast %72 : vector<16x1xf32> to vector<16x32xf32>
      %74 = arith.mulf %71, %73 : vector<16x32xf32>
      %c0_32 = arith.constant 0 : index
      %c0_33 = arith.constant 0 : index
      %75 = vector.load %arg9[%c0_32, %c0_33] : memref<32x32xf32, #tpu.memory_space<vmem>>, vector<32x32xf32>
      %cst_34 = arith.constant dense<0.000000e+00> : vector<16x32xf32>
      %76 = tpu.matmul %74, %75, %cst_34 {dimension_numbers = #tpu.dot_dimension_numbers<[1], [0], [0], [1], [0, 0, 1, 1], [], []>} : vector<16x32xf32>, vector<32x32xf32>, vector<16x32xf32> -> vector<16x32xf32>
      %c0_35 = arith.constant 0 : index
      %c0_36 = arith.constant 0 : index
      %77 = vector.load %arg10[%c0_35, %c0_36] : memref<1x32xf32, #tpu.memory_space<vmem>>, vector<1x32xf32>
      %78 = vector.broadcast %77 : vector<1x32xf32> to vector<16x32xf32>
      %79 = arith.addf %76, %78 : vector<16x32xf32>
      %cst_37 = arith.constant 0.000000e+00 : f32
      %80 = vector.broadcast %cst_37 : f32 to vector<16x32xf32>
      %81 = arith.cmpf oge, %79, %80 : vector<16x32xf32>
      %cst_38 = arith.constant 0.229166672 : f32
      %82 = vector.broadcast %cst_38 : f32 to vector<16x32xf32>
      %83 = arith.mulf %79, %82 : vector<16x32xf32>
      %84 = arith.select %81, %79, %83 : vector<16x32xi1>, vector<16x32xf32>
      %c0_39 = arith.constant 0 : index
      %c0_40 = arith.constant 0 : index
      %85 = vector.load %arg11[%c0_39, %c0_40] : memref<1x32xf32, #tpu.memory_space<vmem>>, vector<1x32xf32>
      %c0_41 = arith.constant 0 : index
      %c0_42 = arith.constant 0 : index
      %86 = vector.load %arg12[%c0_41, %c0_42] : memref<1x32xf32, #tpu.memory_space<vmem>>, vector<1x32xf32>
      %cst_43 = arith.constant dense<0.000000e+00> : vector<16xf32>
      %87 = vector.multi_reduction <add>, %84, %cst_43 [1] : vector<16x32xf32> to vector<16xf32>
      %88 = vector.shape_cast %87 : vector<16xf32> to vector<16x1xf32>
      %cst_44 = arith.constant 3.200000e+01 : f32
      %89 = vector.broadcast %cst_44 : f32 to vector<16x1xf32>
      %90 = arith.divf %88, %89 : vector<16x1xf32>
      %91 = vector.broadcast %90 : vector<16x1xf32> to vector<16x32xf32>
      %92 = arith.subf %84, %91 : vector<16x32xf32>
      %93 = arith.mulf %92, %92 : vector<16x32xf32>
      %cst_45 = arith.constant dense<0.000000e+00> : vector<16xf32>
      %94 = vector.multi_reduction <add>, %93, %cst_45 [1] : vector<16x32xf32> to vector<16xf32>
      %95 = vector.shape_cast %94 : vector<16xf32> to vector<16x1xf32>
      %cst_46 = arith.constant 3.200000e+01 : f32
      %96 = vector.broadcast %cst_46 : f32 to vector<16x1xf32>
      %97 = arith.divf %95, %96 : vector<16x1xf32>
      %98 = vector.broadcast %90 : vector<16x1xf32> to vector<16x32xf32>
      %99 = arith.subf %84, %98 : vector<16x32xf32>
      %cst_47 = arith.constant 9.99999974E-6 : f32
      %100 = vector.broadcast %cst_47 : f32 to vector<16x1xf32>
      %101 = arith.addf %97, %100 : vector<16x1xf32>
      %102 = math.rsqrt %101 : vector<16x1xf32>
      %103 = vector.broadcast %102 : vector<16x1xf32> to vector<16x32xf32>
      %104 = arith.mulf %99, %103 : vector<16x32xf32>
      %105 = vector.broadcast %85 : vector<1x32xf32> to vector<16x32xf32>
      %106 = arith.mulf %104, %105 : vector<16x32xf32>
      %107 = vector.broadcast %86 : vector<1x32xf32> to vector<16x32xf32>
      %108 = arith.addf %106, %107 : vector<16x32xf32>
      %c0_48 = arith.constant 0 : index
      %c0_49 = arith.constant 0 : index
      %109 = vector.load %arg13[%c0_48, %c0_49] : memref<16x32xf32, #tpu.memory_space<vmem>>, vector<16x32xf32>
      tpu.vector_store %arg13[%c0_48, %c0_49], %108 {strides = array<i32>} : memref<16x32xf32, #tpu.memory_space<vmem>>, vector<16x32xf32>,
    } else {
    }
    return
  }
  func.func @transform_0(%arg0: i32) -> (i32, i32) {
    %c0_i32 = arith.constant 0 : i32
    %c0_i32_0 = arith.constant 0 : i32
    return %arg0, %c0_i32 : i32, i32
  }
  func.func @transform_1(%arg0: i32) -> (i32, i32) {
    %c0_i32 = arith.constant 0 : i32
    %c0_i32_0 = arith.constant 0 : i32
    return %c0_i32, %arg0 : i32, i32
  }
  func.func @transform_2(%arg0: i32) -> (i32, i32) {
    %c0_i32 = arith.constant 0 : i32
    %c0_i32_0 = arith.constant 0 : i32
    %c0_i32_1 = arith.constant 0 : i32
    return %c0_i32, %c0_i32_0 : i32, i32
  }
  func.func @transform_3(%arg0: i32) -> (i32, i32) {
    %c0_i32 = arith.constant 0 : i32
    %c0_i32_0 = arith.constant 0 : i32
    %c0_i32_1 = arith.constant 0 : i32
    return %c0_i32, %c0_i32_0 : i32, i32
  }
  func.func @transform_4(%arg0: i32) -> (i32, i32) {
    %c0_i32 = arith.constant 0 : i32
    %c0_i32_0 = arith.constant 0 : i32
    %c0_i32_1 = arith.constant 0 : i32
    return %c0_i32, %c0_i32_0 : i32, i32
  }
  func.func @transform_5(%arg0: i32) -> (i32, i32) {
    %c0_i32 = arith.constant 0 : i32
    %c0_i32_0 = arith.constant 0 : i32
    %c0_i32_1 = arith.constant 0 : i32
    return %c0_i32, %c0_i32_0 : i32, i32
  }
  func.func @transform_6(%arg0: i32) -> (i32, i32) {
    %c0_i32 = arith.constant 0 : i32
    %c0_i32_0 = arith.constant 0 : i32
    %c0_i32_1 = arith.constant 0 : i32
    return %c0_i32, %c0_i32_0 : i32, i32
  }
  func.func @transform_7(%arg0: i32) -> (i32, i32) {
    %c0_i32 = arith.constant 0 : i32
    %c0_i32_0 = arith.constant 0 : i32
    %c0_i32_1 = arith.constant 0 : i32
    return %c0_i32, %c0_i32_0 : i32, i32
  }
  func.func @transform_8(%arg0: i32) -> (i32, i32) {
    %c0_i32 = arith.constant 0 : i32
    %c0_i32_0 = arith.constant 0 : i32
    %c0_i32_1 = arith.constant 0 : i32
    return %c0_i32, %c0_i32_0 : i32, i32
  }
  func.func @transform_9(%arg0: i32) -> (i32, i32) {
    %c0_i32 = arith.constant 0 : i32
    %c0_i32_0 = arith.constant 0 : i32
    %c0_i32_1 = arith.constant 0 : i32
    return %c0_i32, %c0_i32_0 : i32, i32
  }
  func.func @transform_10(%arg0: i32) -> (i32, i32) {
    %c0_i32 = arith.constant 0 : i32
    %c0_i32_0 = arith.constant 0 : i32
    %c0_i32_1 = arith.constant 0 : i32
    return %c0_i32, %c0_i32_0 : i32, i32
  }
  func.func @transform_11(%arg0: i32) -> (i32, i32) {
    %c0_i32 = arith.constant 0 : i32
    %c0_i32_0 = arith.constant 0 : i32
    %c0_i32_1 = arith.constant 0 : i32
    return %c0_i32, %c0_i32_0 : i32, i32
  }
  func.func @transform_12(%arg0: i32) -> (i32, i32) {
    %c0_i32 = arith.constant 0 : i32
    %c0_i32_0 = arith.constant 0 : i32
    %c0_i32_1 = arith.constant 0 : i32
    return %c0_i32, %c0_i32_0 : i32, i32
  }
}

module attributes {stable_mosaic.version = 11 : i64} {
  func.func @_rel_layer_kernel(%arg0: i32, %arg1: memref<16x4xi32, #tpu.memory_space<vmem>>, %arg2: memref<1x16xi32, #tpu.memory_space<vmem>>, %arg3: memref<16x32xf32, #tpu.memory_space<vmem>>, %arg4: memref<16x32xf32, #tpu.memory_space<vmem>>, %arg5: memref<8x33xf32, #tpu.memory_space<vmem>>, %arg6: memref<8x8xf32, #tpu.memory_space<vmem>>, %arg7: memref<8x32xf32, #tpu.memory_space<vmem>>, %arg8: memref<1x32xf32, #tpu.memory_space<vmem>>, %arg9: memref<1x1xf32, #tpu.memory_space<vmem>>, %arg10: memref<32x32xf32, #tpu.memory_space<vmem>>, %arg11: memref<1x32xf32, #tpu.memory_space<vmem>>, %arg12: memref<1x32xf32, #tpu.memory_space<vmem>>, %arg13: memref<1x32xf32, #tpu.memory_space<vmem>>, %arg14: memref<8x32xf32, #tpu.memory_space<vmem>>) attributes {dimension_semantics = [#tpu.dimension_semantics<arbitrary>], iteration_bounds = array<i64: 1>, scalar_prefetch = 0 : i64, scratch_operands = 0 : i64, tpu.core_type = #tpu.core_type<tc>, window_params = [{transform_indices = @transform_0, window_bounds = array<i64: 16, 4>}, {transform_indices = @transform_1, window_bounds = array<i64: 1, 16>}, {pipeline_mode = #tpu.pipeline_mode<synchronous>, transform_indices = @transform_2, window_bounds = array<i64: 16, 32>}, {pipeline_mode = #tpu.pipeline_mode<synchronous>, transform_indices = @transform_3, window_bounds = array<i64: 16, 32>}, {pipeline_mode = #tpu.pipeline_mode<synchronous>, transform_indices = @transform_4, window_bounds = array<i64: 8, 33>}, {pipeline_mode = #tpu.pipeline_mode<synchronous>, transform_indices = @transform_5, window_bounds = array<i64: 8, 8>}, {pipeline_mode = #tpu.pipeline_mode<synchronous>, transform_indices = @transform_6, window_bounds = array<i64: 8, 32>}, {pipeline_mode = #tpu.pipeline_mode<synchronous>, transform_indices = @transform_7, window_bounds = array<i64: 1, 32>}, {pipeline_mode = #tpu.pipeline_mode<synchronous>, transform_indices = @transform_8, window_bounds = array<i64: 1, 1>}, {pipeline_mode = #tpu.pipeline_mode<synchronous>, transform_indices = @transform_9, window_bounds = array<i64: 32, 32>}, {pipeline_mode = #tpu.pipeline_mode<synchronous>, transform_indices = @transform_10, window_bounds = array<i64: 1, 32>}, {pipeline_mode = #tpu.pipeline_mode<synchronous>, transform_indices = @transform_11, window_bounds = array<i64: 1, 32>}, {pipeline_mode = #tpu.pipeline_mode<synchronous>, transform_indices = @transform_12, window_bounds = array<i64: 1, 32>}, {pipeline_mode = #tpu.pipeline_mode<synchronous>, transform_indices = @transform_13, window_bounds = array<i64: 8, 32>}]} {
    %c0_i32 = arith.constant 0 : i32
    %0 = arith.cmpi eq, %arg0, %c0_i32 : i32
    %1 = arith.extui %0 : i1 to i32
    %c0_i32_0 = arith.constant 0 : i32
    %2 = arith.cmpi ne, %1, %c0_i32_0 : i32
    scf.if %2 {
      %cst_31 = arith.constant 0.000000e+00 : f32
      %75 = vector.broadcast %cst_31 : f32 to vector<8x32xf32>
      %c0_32 = arith.constant 0 : index
      %c0_33 = arith.constant 0 : index
      %76 = vector.load %arg14[%c0_32, %c0_33] : memref<8x32xf32, #tpu.memory_space<vmem>>, vector<8x32xf32>
      tpu.vector_store %arg14[%c0_32, %c0_33], %75 {strides = array<i32>} : memref<8x32xf32, #tpu.memory_space<vmem>>, vector<8x32xf32>,
    } else {
    }
    %c0 = arith.constant 0 : index
    %c0_1 = arith.constant 0 : index
    %3 = vector.load %arg1[%c0, %c0_1] : memref<16x4xi32, #tpu.memory_space<vmem>>, vector<16x4xi32>
    %4 = vector.extract_strided_slice %3 {offsets = [0, 0], sizes = [16, 1], strides = [1, 1]} : vector<16x4xi32> to vector<16x1xi32>
    %c0_2 = arith.constant 0 : index
    %c0_3 = arith.constant 0 : index
    %5 = vector.load %arg3[%c0_2, %c0_3] : memref<16x32xf32, #tpu.memory_space<vmem>>, vector<16x32xf32>
    %6 = tpu.iota {dimensions = array<i32: 1>} : vector<16x16xi32>
    %7 = vector.broadcast %4 : vector<16x1xi32> to vector<16x16xi32>
    %8 = arith.cmpi eq, %7, %6 : vector<16x16xi32>
    %9 = arith.extui %8 : vector<16x16xi1> to vector<16x16xi32>
    %10 = arith.sitofp %9 : vector<16x16xi32> to vector<16x16xf32>
    %cst = arith.constant dense<0.000000e+00> : vector<16x32xf32>
    %11 = tpu.matmul %10, %5, %cst {dimension_numbers = #tpu.dot_dimension_numbers<[1], [0], [0], [1], [0, 0, 1, 1], [], []>} : vector<16x16xf32>, vector<16x32xf32>, vector<16x32xf32> -> vector<16x32xf32>
    %12 = vector.extract_strided_slice %3 {offsets = [0, 1], sizes = [16, 1], strides = [1, 1]} : vector<16x4xi32> to vector<16x1xi32>
    %c0_4 = arith.constant 0 : index
    %c0_5 = arith.constant 0 : index
    %13 = vector.load %arg4[%c0_4, %c0_5] : memref<16x32xf32, #tpu.memory_space<vmem>>, vector<16x32xf32>
    %14 = tpu.iota {dimensions = array<i32: 1>} : vector<16x16xi32>
    %15 = vector.broadcast %12 : vector<16x1xi32> to vector<16x16xi32>
    %16 = arith.cmpi eq, %15, %14 : vector<16x16xi32>
    %17 = arith.extui %16 : vector<16x16xi1> to vector<16x16xi32>
    %18 = arith.sitofp %17 : vector<16x16xi32> to vector<16x16xf32>
    %cst_6 = arith.constant dense<0.000000e+00> : vector<16x32xf32>
    %19 = tpu.matmul %18, %13, %cst_6 {dimension_numbers = #tpu.dot_dimension_numbers<[1], [0], [0], [1], [0, 0, 1, 1], [], []>} : vector<16x16xf32>, vector<16x32xf32>, vector<16x32xf32> -> vector<16x32xf32>
    %20 = vector.extract_strided_slice %3 {offsets = [0, 2], sizes = [16, 1], strides = [1, 1]} : vector<16x4xi32> to vector<16x1xi32>
    %c0_7 = arith.constant 0 : index
    %c0_8 = arith.constant 0 : index
    %21 = vector.load %arg5[%c0_7, %c0_8] : memref<8x33xf32, #tpu.memory_space<vmem>>, vector<8x33xf32>
    %22 = tpu.iota {dimensions = array<i32: 1>} : vector<16x8xi32>
    %23 = vector.broadcast %20 : vector<16x1xi32> to vector<16x8xi32>
    %24 = arith.cmpi eq, %23, %22 : vector<16x8xi32>
    %25 = arith.extui %24 : vector<16x8xi1> to vector<16x8xi32>
    %26 = arith.sitofp %25 : vector<16x8xi32> to vector<16x8xf32>
    %cst_9 = arith.constant dense<0.000000e+00> : vector<16x33xf32>
    %27 = tpu.matmul %26, %21, %cst_9 {dimension_numbers = #tpu.dot_dimension_numbers<[1], [0], [0], [1], [0, 0, 1, 1], [], []>} : vector<16x8xf32>, vector<8x33xf32>, vector<16x33xf32> -> vector<16x33xf32>
    %28 = vector.extract_strided_slice %3 {offsets = [0, 3], sizes = [16, 1], strides = [1, 1]} : vector<16x4xi32> to vector<16x1xi32>
    %c0_10 = arith.constant 0 : index
    %c0_11 = arith.constant 0 : index
    %29 = vector.load %arg6[%c0_10, %c0_11] : memref<8x8xf32, #tpu.memory_space<vmem>>, vector<8x8xf32>
    %30 = tpu.iota {dimensions = array<i32: 1>} : vector<16x8xi32>
    %31 = vector.broadcast %28 : vector<16x1xi32> to vector<16x8xi32>
    %32 = arith.cmpi eq, %31, %30 : vector<16x8xi32>
    %33 = arith.extui %32 : vector<16x8xi1> to vector<16x8xi32>
    %34 = arith.sitofp %33 : vector<16x8xi32> to vector<16x8xf32>
    %cst_12 = arith.constant dense<0.000000e+00> : vector<16x8xf32>
    %35 = tpu.matmul %34, %29, %cst_12 {dimension_numbers = #tpu.dot_dimension_numbers<[1], [0], [0], [1], [0, 0, 1, 1], [], []>} : vector<16x8xf32>, vector<8x8xf32>, vector<16x8xf32> -> vector<16x8xf32>
    %36 = arith.addf %11, %19 : vector<16x32xf32>
    %37 = vector.extract_strided_slice %27 {offsets = [0, 0], sizes = [16, 32], strides = [1, 1]} : vector<16x33xf32> to vector<16x32xf32>
    %38 = arith.addf %36, %37 : vector<16x32xf32>
    %c0_13 = arith.constant 0 : index
    %c0_14 = arith.constant 0 : index
    %39 = vector.load %arg8[%c0_13, %c0_14] : memref<1x32xf32, #tpu.memory_space<vmem>>, vector<1x32xf32>
    %40 = vector.broadcast %39 : vector<1x32xf32> to vector<16x32xf32>
    %41 = arith.addf %38, %40 : vector<16x32xf32>
    %cst_15 = arith.constant 0.000000e+00 : f32
    %42 = vector.broadcast %cst_15 : f32 to vector<16x32xf32>
    %43 = arith.cmpf oge, %41, %42 : vector<16x32xf32>
    %cst_16 = arith.constant 0.229166672 : f32
    %44 = vector.broadcast %cst_16 : f32 to vector<16x32xf32>
    %45 = arith.mulf %41, %44 : vector<16x32xf32>
    %46 = arith.select %43, %41, %45 : vector<16x32xi1>, vector<16x32xf32>
    %47 = vector.extract_strided_slice %35 {offsets = [0, 0], sizes = [16, 1], strides = [1, 1]} : vector<16x8xf32> to vector<16x1xf32>
    %48 = vector.extract_strided_slice %27 {offsets = [0, 32], sizes = [16, 1], strides = [1, 1]} : vector<16x33xf32> to vector<16x1xf32>
    %49 = arith.addf %47, %48 : vector<16x1xf32>
    %c0_17 = arith.constant 0 : index
    %c0_18 = arith.constant 0 : index
    %50 = vector.load %arg9[%c0_17, %c0_18] : memref<1x1xf32, #tpu.memory_space<vmem>>, vector<1x1xf32>
    %51 = vector.broadcast %50 : vector<1x1xf32> to vector<16x1xf32>
    %52 = arith.addf %49, %51 : vector<16x1xf32>
    %cst_19 = arith.constant 5.000000e-01 : f32
    %53 = vector.broadcast %cst_19 : f32 to vector<16x1xf32>
    %54 = arith.mulf %53, %52 : vector<16x1xf32>
    %55 = math.tanh %54 : vector<16x1xf32>
    %cst_20 = arith.constant 1.000000e+00 : f32
    %56 = vector.broadcast %cst_20 : f32 to vector<16x1xf32>
    %57 = arith.addf %55, %56 : vector<16x1xf32>
    %cst_21 = arith.constant 5.000000e-01 : f32
    %58 = vector.broadcast %cst_21 : f32 to vector<16x1xf32>
    %59 = arith.mulf %58, %57 : vector<16x1xf32>
    %60 = vector.broadcast %59 : vector<16x1xf32> to vector<16x32xf32>
    %61 = arith.mulf %46, %60 : vector<16x32xf32>
    %c0_22 = arith.constant 0 : index
    %c0_23 = arith.constant 0 : index
    %62 = vector.load %arg2[%c0_22, %c0_23] : memref<1x16xi32, #tpu.memory_space<vmem>>, vector<1x16xi32>
    %63 = tpu.iota {dimensions = array<i32: 0>} : vector<8x16xi32>
    %64 = vector.broadcast %62 : vector<1x16xi32> to vector<8x16xi32>
    %65 = arith.cmpi eq, %64, %63 : vector<8x16xi32>
    %66 = arith.extui %65 : vector<8x16xi1> to vector<8x16xi32>
    %67 = arith.sitofp %66 : vector<8x16xi32> to vector<8x16xf32>
    %c0_24 = arith.constant 0 : index
    %c0_25 = arith.constant 0 : index
    %68 = vector.load %arg14[%c0_24, %c0_25] : memref<8x32xf32, #tpu.memory_space<vmem>>, vector<8x32xf32>
    %cst_26 = arith.constant dense<0.000000e+00> : vector<8x32xf32>
    %69 = tpu.matmul %67, %61, %cst_26 {dimension_numbers = #tpu.dot_dimension_numbers<[1], [0], [0], [1], [0, 0, 1, 1], [], []>} : vector<8x16xf32>, vector<16x32xf32>, vector<8x32xf32> -> vector<8x32xf32>
    %70 = arith.addf %68, %69 : vector<8x32xf32>
    %c0_27 = arith.constant 0 : index
    %c0_28 = arith.constant 0 : index
    %71 = vector.load %arg14[%c0_27, %c0_28] : memref<8x32xf32, #tpu.memory_space<vmem>>, vector<8x32xf32>
    tpu.vector_store %arg14[%c0_27, %c0_28], %70 {strides = array<i32>} : memref<8x32xf32, #tpu.memory_space<vmem>>, vector<8x32xf32>,
    %c0_i32_29 = arith.constant 0 : i32
    %72 = arith.cmpi eq, %arg0, %c0_i32_29 : i32
    %73 = arith.extui %72 : i1 to i32
    %c0_i32_30 = arith.constant 0 : i32
    %74 = arith.cmpi ne, %73, %c0_i32_30 : i32
    scf.if %74 {
      %c0_31 = arith.constant 0 : index
      %c0_32 = arith.constant 0 : index
      %75 = vector.load %arg14[%c0_31, %c0_32] : memref<8x32xf32, #tpu.memory_space<vmem>>, vector<8x32xf32>
      %c0_33 = arith.constant 0 : index
      %c0_34 = arith.constant 0 : index
      %76 = vector.load %arg10[%c0_33, %c0_34] : memref<32x32xf32, #tpu.memory_space<vmem>>, vector<32x32xf32>
      %cst_35 = arith.constant dense<0.000000e+00> : vector<8x32xf32>
      %77 = tpu.matmul %75, %76, %cst_35 {dimension_numbers = #tpu.dot_dimension_numbers<[1], [0], [0], [1], [0, 0, 1, 1], [], []>} : vector<8x32xf32>, vector<32x32xf32>, vector<8x32xf32> -> vector<8x32xf32>
      %c0_36 = arith.constant 0 : index
      %c0_37 = arith.constant 0 : index
      %78 = vector.load %arg11[%c0_36, %c0_37] : memref<1x32xf32, #tpu.memory_space<vmem>>, vector<1x32xf32>
      %79 = vector.broadcast %78 : vector<1x32xf32> to vector<8x32xf32>
      %80 = arith.addf %77, %79 : vector<8x32xf32>
      %cst_38 = arith.constant 0.000000e+00 : f32
      %81 = vector.broadcast %cst_38 : f32 to vector<8x32xf32>
      %82 = arith.cmpf oge, %80, %81 : vector<8x32xf32>
      %cst_39 = arith.constant 0.229166672 : f32
      %83 = vector.broadcast %cst_39 : f32 to vector<8x32xf32>
      %84 = arith.mulf %80, %83 : vector<8x32xf32>
      %85 = arith.select %82, %80, %84 : vector<8x32xi1>, vector<8x32xf32>
      %c0_40 = arith.constant 0 : index
      %c0_41 = arith.constant 0 : index
      %86 = vector.load %arg7[%c0_40, %c0_41] : memref<8x32xf32, #tpu.memory_space<vmem>>, vector<8x32xf32>
      %87 = arith.addf %85, %86 : vector<8x32xf32>
      %c0_42 = arith.constant 0 : index
      %c0_43 = arith.constant 0 : index
      %88 = vector.load %arg12[%c0_42, %c0_43] : memref<1x32xf32, #tpu.memory_space<vmem>>, vector<1x32xf32>
      %c0_44 = arith.constant 0 : index
      %c0_45 = arith.constant 0 : index
      %89 = vector.load %arg13[%c0_44, %c0_45] : memref<1x32xf32, #tpu.memory_space<vmem>>, vector<1x32xf32>
      %cst_46 = arith.constant dense<0.000000e+00> : vector<8xf32>
      %90 = vector.multi_reduction <add>, %87, %cst_46 [1] : vector<8x32xf32> to vector<8xf32>
      %91 = vector.shape_cast %90 : vector<8xf32> to vector<8x1xf32>
      %cst_47 = arith.constant 3.200000e+01 : f32
      %92 = vector.broadcast %cst_47 : f32 to vector<8x1xf32>
      %93 = arith.divf %91, %92 : vector<8x1xf32>
      %94 = vector.broadcast %93 : vector<8x1xf32> to vector<8x32xf32>
      %95 = arith.subf %87, %94 : vector<8x32xf32>
      %96 = arith.mulf %95, %95 : vector<8x32xf32>
      %cst_48 = arith.constant dense<0.000000e+00> : vector<8xf32>
      %97 = vector.multi_reduction <add>, %96, %cst_48 [1] : vector<8x32xf32> to vector<8xf32>
      %98 = vector.shape_cast %97 : vector<8xf32> to vector<8x1xf32>
      %cst_49 = arith.constant 3.200000e+01 : f32
      %99 = vector.broadcast %cst_49 : f32 to vector<8x1xf32>
      %100 = arith.divf %98, %99 : vector<8x1xf32>
      %101 = vector.broadcast %93 : vector<8x1xf32> to vector<8x32xf32>
      %102 = arith.subf %87, %101 : vector<8x32xf32>
      %cst_50 = arith.constant 9.99999974E-6 : f32
      %103 = vector.broadcast %cst_50 : f32 to vector<8x1xf32>
      %104 = arith.addf %100, %103 : vector<8x1xf32>
      %105 = math.rsqrt %104 : vector<8x1xf32>
      %106 = vector.broadcast %105 : vector<8x1xf32> to vector<8x32xf32>
      %107 = arith.mulf %102, %106 : vector<8x32xf32>
      %108 = vector.broadcast %88 : vector<1x32xf32> to vector<8x32xf32>
      %109 = arith.mulf %107, %108 : vector<8x32xf32>
      %110 = vector.broadcast %89 : vector<1x32xf32> to vector<8x32xf32>
      %111 = arith.addf %109, %110 : vector<8x32xf32>
      %c0_51 = arith.constant 0 : index
      %c0_52 = arith.constant 0 : index
      %112 = vector.load %arg14[%c0_51, %c0_52] : memref<8x32xf32, #tpu.memory_space<vmem>>, vector<8x32xf32>
      tpu.vector_store %arg14[%c0_51, %c0_52], %111 {strides = array<i32>} : memref<8x32xf32, #tpu.memory_space<vmem>>, vector<8x32xf32>,
    } else {
    }
    return
  }
  func.func @transform_0(%arg0: i32) -> (i32, i32) {
    %c0_i32 = arith.constant 0 : i32
    %c0_i32_0 = arith.constant 0 : i32
    return %arg0, %c0_i32 : i32, i32
  }
  func.func @transform_1(%arg0: i32) -> (i32, i32) {
    %c0_i32 = arith.constant 0 : i32
    %c0_i32_0 = arith.constant 0 : i32
    return %c0_i32, %arg0 : i32, i32
  }
  func.func @transform_2(%arg0: i32) -> (i32, i32) {
    %c0_i32 = arith.constant 0 : i32
    %c0_i32_0 = arith.constant 0 : i32
    %c0_i32_1 = arith.constant 0 : i32
    return %c0_i32, %c0_i32_0 : i32, i32
  }
  func.func @transform_3(%arg0: i32) -> (i32, i32) {
    %c0_i32 = arith.constant 0 : i32
    %c0_i32_0 = arith.constant 0 : i32
    %c0_i32_1 = arith.constant 0 : i32
    return %c0_i32, %c0_i32_0 : i32, i32
  }
  func.func @transform_4(%arg0: i32) -> (i32, i32) {
    %c0_i32 = arith.constant 0 : i32
    %c0_i32_0 = arith.constant 0 : i32
    %c0_i32_1 = arith.constant 0 : i32
    return %c0_i32, %c0_i32_0 : i32, i32
  }
  func.func @transform_5(%arg0: i32) -> (i32, i32) {
    %c0_i32 = arith.constant 0 : i32
    %c0_i32_0 = arith.constant 0 : i32
    %c0_i32_1 = arith.constant 0 : i32
    return %c0_i32, %c0_i32_0 : i32, i32
  }
  func.func @transform_6(%arg0: i32) -> (i32, i32) {
    %c0_i32 = arith.constant 0 : i32
    %c0_i32_0 = arith.constant 0 : i32
    %c0_i32_1 = arith.constant 0 : i32
    return %c0_i32, %c0_i32_0 : i32, i32
  }
  func.func @transform_7(%arg0: i32) -> (i32, i32) {
    %c0_i32 = arith.constant 0 : i32
    %c0_i32_0 = arith.constant 0 : i32
    %c0_i32_1 = arith.constant 0 : i32
    return %c0_i32, %c0_i32_0 : i32, i32
  }
  func.func @transform_8(%arg0: i32) -> (i32, i32) {
    %c0_i32 = arith.constant 0 : i32
    %c0_i32_0 = arith.constant 0 : i32
    %c0_i32_1 = arith.constant 0 : i32
    return %c0_i32, %c0_i32_0 : i32, i32
  }
  func.func @transform_9(%arg0: i32) -> (i32, i32) {
    %c0_i32 = arith.constant 0 : i32
    %c0_i32_0 = arith.constant 0 : i32
    %c0_i32_1 = arith.constant 0 : i32
    return %c0_i32, %c0_i32_0 : i32, i32
  }
  func.func @transform_10(%arg0: i32) -> (i32, i32) {
    %c0_i32 = arith.constant 0 : i32
    %c0_i32_0 = arith.constant 0 : i32
    %c0_i32_1 = arith.constant 0 : i32
    return %c0_i32, %c0_i32_0 : i32, i32
  }
  func.func @transform_11(%arg0: i32) -> (i32, i32) {
    %c0_i32 = arith.constant 0 : i32
    %c0_i32_0 = arith.constant 0 : i32
    %c0_i32_1 = arith.constant 0 : i32
    return %c0_i32, %c0_i32_0 : i32, i32
  }
  func.func @transform_12(%arg0: i32) -> (i32, i32) {
    %c0_i32 = arith.constant 0 : i32
    %c0_i32_0 = arith.constant 0 : i32
    %c0_i32_1 = arith.constant 0 : i32
    return %c0_i32, %c0_i32_0 : i32, i32
  }
  func.func @transform_13(%arg0: i32) -> (i32, i32) {
    %c0_i32 = arith.constant 0 : i32
    %c0_i32_0 = arith.constant 0 : i32
    %c0_i32_1 = arith.constant 0 : i32
    return %c0_i32, %c0_i32_0 : i32, i32
  }
}

module attributes {stable_mosaic.version = 11 : i64} {
  func.func @_transfer_ln_kernel(%arg0: i32, %arg1: memref<8x64xf32, #tpu.memory_space<vmem>>, %arg2: memref<64x32xf32, #tpu.memory_space<vmem>>, %arg3: memref<1x32xf32, #tpu.memory_space<vmem>>, %arg4: memref<1x32xf32, #tpu.memory_space<vmem>>, %arg5: memref<1x32xf32, #tpu.memory_space<vmem>>, %arg6: memref<8x32xf32, #tpu.memory_space<vmem>>) attributes {dimension_semantics = [#tpu.dimension_semantics<parallel>], iteration_bounds = array<i64: 1>, scalar_prefetch = 0 : i64, scratch_operands = 0 : i64, tpu.core_type = #tpu.core_type<tc>, window_params = [{transform_indices = @transform_0, window_bounds = array<i64: 8, 64>}, {pipeline_mode = #tpu.pipeline_mode<synchronous>, transform_indices = @transform_1, window_bounds = array<i64: 64, 32>}, {pipeline_mode = #tpu.pipeline_mode<synchronous>, transform_indices = @transform_2, window_bounds = array<i64: 1, 32>}, {pipeline_mode = #tpu.pipeline_mode<synchronous>, transform_indices = @transform_3, window_bounds = array<i64: 1, 32>}, {pipeline_mode = #tpu.pipeline_mode<synchronous>, transform_indices = @transform_4, window_bounds = array<i64: 1, 32>}, {transform_indices = @transform_5, window_bounds = array<i64: 8, 32>}]} {
    %c0 = arith.constant 0 : index
    %c0_0 = arith.constant 0 : index
    %0 = vector.load %arg1[%c0, %c0_0] : memref<8x64xf32, #tpu.memory_space<vmem>>, vector<8x64xf32>
    %c0_1 = arith.constant 0 : index
    %c0_2 = arith.constant 0 : index
    %1 = vector.load %arg2[%c0_1, %c0_2] : memref<64x32xf32, #tpu.memory_space<vmem>>, vector<64x32xf32>
    %cst = arith.constant dense<0.000000e+00> : vector<8x32xf32>
    %2 = tpu.matmul %0, %1, %cst {dimension_numbers = #tpu.dot_dimension_numbers<[1], [0], [0], [1], [0, 0, 1, 1], [], []>} : vector<8x64xf32>, vector<64x32xf32>, vector<8x32xf32> -> vector<8x32xf32>
    %c0_3 = arith.constant 0 : index
    %c0_4 = arith.constant 0 : index
    %3 = vector.load %arg3[%c0_3, %c0_4] : memref<1x32xf32, #tpu.memory_space<vmem>>, vector<1x32xf32>
    %4 = vector.broadcast %3 : vector<1x32xf32> to vector<8x32xf32>
    %5 = arith.addf %2, %4 : vector<8x32xf32>
    %cst_5 = arith.constant 0.000000e+00 : f32
    %6 = vector.broadcast %cst_5 : f32 to vector<8x32xf32>
    %7 = arith.cmpf oge, %5, %6 : vector<8x32xf32>
    %cst_6 = arith.constant 0.229166672 : f32
    %8 = vector.broadcast %cst_6 : f32 to vector<8x32xf32>
    %9 = arith.mulf %5, %8 : vector<8x32xf32>
    %10 = arith.select %7, %5, %9 : vector<8x32xi1>, vector<8x32xf32>
    %c0_7 = arith.constant 0 : index
    %c0_8 = arith.constant 0 : index
    %11 = vector.load %arg4[%c0_7, %c0_8] : memref<1x32xf32, #tpu.memory_space<vmem>>, vector<1x32xf32>
    %c0_9 = arith.constant 0 : index
    %c0_10 = arith.constant 0 : index
    %12 = vector.load %arg5[%c0_9, %c0_10] : memref<1x32xf32, #tpu.memory_space<vmem>>, vector<1x32xf32>
    %cst_11 = arith.constant dense<0.000000e+00> : vector<8xf32>
    %13 = vector.multi_reduction <add>, %10, %cst_11 [1] : vector<8x32xf32> to vector<8xf32>
    %14 = vector.shape_cast %13 : vector<8xf32> to vector<8x1xf32>
    %cst_12 = arith.constant 3.200000e+01 : f32
    %15 = vector.broadcast %cst_12 : f32 to vector<8x1xf32>
    %16 = arith.divf %14, %15 : vector<8x1xf32>
    %17 = vector.broadcast %16 : vector<8x1xf32> to vector<8x32xf32>
    %18 = arith.subf %10, %17 : vector<8x32xf32>
    %19 = arith.mulf %18, %18 : vector<8x32xf32>
    %cst_13 = arith.constant dense<0.000000e+00> : vector<8xf32>
    %20 = vector.multi_reduction <add>, %19, %cst_13 [1] : vector<8x32xf32> to vector<8xf32>
    %21 = vector.shape_cast %20 : vector<8xf32> to vector<8x1xf32>
    %cst_14 = arith.constant 3.200000e+01 : f32
    %22 = vector.broadcast %cst_14 : f32 to vector<8x1xf32>
    %23 = arith.divf %21, %22 : vector<8x1xf32>
    %24 = vector.broadcast %16 : vector<8x1xf32> to vector<8x32xf32>
    %25 = arith.subf %10, %24 : vector<8x32xf32>
    %cst_15 = arith.constant 9.99999974E-6 : f32
    %26 = vector.broadcast %cst_15 : f32 to vector<8x1xf32>
    %27 = arith.addf %23, %26 : vector<8x1xf32>
    %28 = math.rsqrt %27 : vector<8x1xf32>
    %29 = vector.broadcast %28 : vector<8x1xf32> to vector<8x32xf32>
    %30 = arith.mulf %25, %29 : vector<8x32xf32>
    %31 = vector.broadcast %11 : vector<1x32xf32> to vector<8x32xf32>
    %32 = arith.mulf %30, %31 : vector<8x32xf32>
    %33 = vector.broadcast %12 : vector<1x32xf32> to vector<8x32xf32>
    %34 = arith.addf %32, %33 : vector<8x32xf32>
    %c0_16 = arith.constant 0 : index
    %c0_17 = arith.constant 0 : index
    %35 = vector.load %arg6[%c0_16, %c0_17] : memref<8x32xf32, #tpu.memory_space<vmem>>, vector<8x32xf32>
    tpu.vector_store %arg6[%c0_16, %c0_17], %34 {strides = array<i32>} : memref<8x32xf32, #tpu.memory_space<vmem>>, vector<8x32xf32>,
    return
  }
  func.func @transform_0(%arg0: i32) -> (i32, i32) {
    %c0_i32 = arith.constant 0 : i32
    %c0_i32_0 = arith.constant 0 : i32
    return %arg0, %c0_i32 : i32, i32
  }
  func.func @transform_1(%arg0: i32) -> (i32, i32) {
    %c0_i32 = arith.constant 0 : i32
    %c0_i32_0 = arith.constant 0 : i32
    %c0_i32_1 = arith.constant 0 : i32
    return %c0_i32, %c0_i32_0 : i32, i32
  }
  func.func @transform_2(%arg0: i32) -> (i32, i32) {
    %c0_i32 = arith.constant 0 : i32
    %c0_i32_0 = arith.constant 0 : i32
    %c0_i32_1 = arith.constant 0 : i32
    return %c0_i32, %c0_i32_0 : i32, i32
  }
  func.func @transform_3(%arg0: i32) -> (i32, i32) {
    %c0_i32 = arith.constant 0 : i32
    %c0_i32_0 = arith.constant 0 : i32
    %c0_i32_1 = arith.constant 0 : i32
    return %c0_i32, %c0_i32_0 : i32, i32
  }
  func.func @transform_4(%arg0: i32) -> (i32, i32) {
    %c0_i32 = arith.constant 0 : i32
    %c0_i32_0 = arith.constant 0 : i32
    %c0_i32_1 = arith.constant 0 : i32
    return %c0_i32, %c0_i32_0 : i32, i32
  }
  func.func @transform_5(%arg0: i32) -> (i32, i32) {
    %c0_i32 = arith.constant 0 : i32
    %c0_i32_0 = arith.constant 0 : i32
    return %arg0, %c0_i32 : i32, i32
  }
}

</mosaic_0001>

<bundles_post_ra>
// kernel: prompt_encoder_forward.9
= control target key start
LH: loop header
LB: loop body
LE: loop exit
PB: predicated region body
PF: predicated region fallthrough
CT: control target
= control target key end

     0   :  { %v198_v0 = vmov 0.0|0.0   ;;  %vm199_vm0 = vmmov 0   ;;  %v200_v4 = vmov 0.0   ;;  %vm36_vm1 = vcmask 523264   ;;  %s273_s1 = inlined_call_operand.vmem [shape: f32[64,32], index: 1, kind: input, shape index: {}]   ;;  %s274_s0 = inlined_call_operand.vmem [shape: f32[8,64], index: 0, kind: input, shape index: {}]   ;;  %s275_s2 = inlined_call_operand.vmem [shape: f32[1,32], index: 2, kind: input, shape index: {}]   ;;  %s276_s3 = inlined_call_operand.vmem [shape: f32[1,32], index: 3, kind: input, shape index: {}]   ;;  %s277_s4 = inlined_call_operand.vmem [shape: f32[1,32], index: 4, kind: input, shape index: {}]   ;;  %s278_s5 = inlined_call_operand.vmem [shape: f32[8,32], index: 5, kind: output, shape index: {}]  }
   0x1   :  { %181 = vmatprep.subr.bf16.mxu0 %v198_v0  ;;  %v21_v1 = vld [vmem:[%s273_s1] sm:$0xff]  ;;  %v22_v2 = vld [vmem:[%s273_s1 + $0x8] sm:$0xff]  ;;  %v23_v3 = vld [vmem:[%s273_s1 + $0x10] sm:$0xff]  ;;  %178 = vmatprep.mubr.msk.f32.mxu0 %vm199_vm0, %v200_v4  ;;  %vm115_vm3 = vcmask 261120  }
   0x2   :  { %v182_v5 = vpack.c.bf16 %v22_v2, %v21_v1  ;;  %v24_v6 = vld [vmem:[%s273_s1 + $0x18] sm:$0xff]  ;;  %v25_v8 = vld [vmem:[%s273_s1 + $0x20] sm:$0xff]  ;;  %v26_v9 = vld [vmem:[%s273_s1 + $0x28] sm:$0xff] }
   0x3   :  { %v185_v7 = vpack.c.bf16 %v24_v6, %v23_v3  ;;  %v188_v10 = vpack.c.bf16 %v26_v9, %v25_v8  ;;  %v27_v11 = vld [vmem:[%s273_s1 + $0x30] sm:$0xff]  ;;  %v28_v12 = vld [vmem:[%s273_s1 + $0x38] sm:$0xff]  ;;  %v20_v14 = vld [vmem:[%s274_s0] sm:$0xff] }
   0x4   :  { %183 = vmatpush3.bf16.msra.mxu0 %v182_v5  ;;  %v191_v13 = vpack.c.bf16 %v28_v12, %v27_v11  ;;  %v149_v15 = vld [vmem:[%s275_s2] ss:$0 sm:$0xff] }
   0x5   :  { %184 = vmatprep.subr.bf16.mxu0 %v198_v0  ;;  %v151_v31 = vld [vmem:[%s276_s3] ss:$0 sm:$0xff] }
   0x6   :  { %v152_v33 = vld [vmem:[%s277_s4] ss:$0 sm:$0xff] }
   0x8   :  { %186 = vmatpush3.bf16.msra.mxu0 %v185_v7 }
   0x9   :  { %187 = vmatprep.subr.bf16.mxu0 %v198_v0 }
   0xc   :  { %189 = vmatpush3.bf16.msra.mxu0 %v188_v10 }
   0xd   :  { %190 = vmatprep.subr.bf16.mxu0 %v198_v0 }
  0x10   :  { %192 = vmatpush3.bf16.msra.mxu0 %v191_v13 }
  0x13   :  { %179 = vmatmul.mubr.msk.f32.vlgmr.msra.gmra.mrb[0].mxu0 %vm36_vm1, %v20_v14 }
  0xe6   :  { %v106_v16 = vpop.f32.mrb[0].mxu0 }
  0xe7   :  { %v107_v17 = vadd.f32 %v149_v15, %v106_v16  ;;  %v180_v18 = vpop.f32.mrb[1].mxu0 }
  0xe9   :  { %v111_v19 = vmul.f32 0.22916667, %v107_v17  ;;  %vm110_vm2 = vcmp.ge.f32.partialorder %v107_v17, 0.0 }
  0xeb   :  { %v112_v20 = vsel %vm110_vm2, %v107_v17, %v111_v19 }
  0xec   :  { %v116_v21 = vsel %vm115_vm3, %v112_v20, 0.0 }
  0xed   :  { %117 = vadd.xlane.f32.xlu0 %v116_v21 }
 0x17a   :  { %v118_v22 = vpop.xlane.xlu0 %117 }
 0x17b   :  { %v120_v23 = vmul.f32 0.03125, %v118_v22 }
 0x17d   :  { %v121_v24 = vsub.f32 %v112_v20, %v120_v23 }
 0x17f   :  { %v122_v25 = vmul.f32 %v121_v24, %v121_v24 }
 0x181   :  { %v123_v26 = vsel %vm115_vm3, %v122_v25, 0.0 }
 0x182   :  { %124 = vadd.xlane.f32.xlu0 %v123_v26 }
 0x20f   :  { %v125_v27 = vpop.xlane.xlu0 %124 }
 0x210   :  { %v126_v28 = vmul.f32 0.03125, %v125_v27 }
 0x212   :  { %v127_v29 = vadd.f32 1e-05, %v126_v28 }
 0x214   :  { %196 = vrsqrt.f32 %v127_v29 }
 0x21e   :  { %v197_v30 = vpop.eup %196 }
 0x21f   :  { %v129_v32 = vmul.f32 %v197_v30, %v121_v24 }
 0x221   :  { %v136_v34 = vmul.f32 %v151_v31, %v129_v32 }
 0x223   :  { %v143_v35 = vadd.f32 %v152_v33, %v136_v34 }
 0x225   :  { %144 = vst.msk [vmem:[%s278_s5] sm:$0xff] %vm115_vm3, %v143_v35 }

// kernel: prompt_encoder_forward.5
= control target key start
LH: loop header
LB: loop body
LE: loop exit
PB: predicated region body
PF: predicated region fallthrough
CT: control target
= control target key end

     0   :  { %v780_v0 = vmov 1   ;;  %v781_v1 = vmov 0   ;;  %v782_v7 = vmov 2   ;;  %s783_s15 = smov 32   ;;  %v54_v12 = vlaneseq  ;;  %s969_s0 = inlined_call_operand.vmem [shape: s32[16,4], index: 0, kind: input, shape index: {}]   ;;  %s970_s2 = inlined_call_operand.vmem [shape: f32[16,33], index: 2, kind: input, shape index: {}]   ;;  %s971_s3 = inlined_call_operand.vmem [shape: f32[8,33], index: 3, kind: input, shape index: {}]   ;;  %s972_s4 = inlined_call_operand.vmem [shape: f32[8,33], index: 4, kind: input, shape index: {}]   ;;  %s973_s7 = inlined_call_operand.<no memory space> [shape: f32[1,1], index: 7, kind: input, shape index: {}]   ;;  %s974_s1 = inlined_call_operand.vmem [shape: s32[1,16], index: 1, kind: input, shape index: {}]   ;;  %s975_s5 = inlined_call_operand.vmem [shape: f32[16,1], index: 5, kind: input, shape index: {}]   ;;  %s976_s12 = inlined_call_operand.vmem [shape: f32[16,32], index: 12, kind: output, shape index: {}]   ;;  %s977_s6 = inlined_call_operand.vmem [shape: f32[1,32], index: 6, kind: input, shape index: {}]   ;;  %s978_s8 = inlined_call_operand.vmem [shape: f32[32,32], index: 8, kind: input, shape index: {}]   ;;  %s979_s9 = inlined_call_operand.vmem [shape: f32[1,32], index: 9, kind: input, shape index: {}]   ;;  %s980_s10 = inlined_call_operand.vmem [shape: f32[1,32], index: 10, kind: input, shape index: {}]   ;;  %s981_s11 = inlined_call_operand.vmem [shape: f32[1,32], index: 11, kind: input, shape index: {}]  }
   0x1   :  { %765 = vset.pattern.permute.xlu1 %v780_v0  ;;  %764 = vset.pattern.permute.xlu0 %v781_v1  ;;  %v50_v2 = vld [vmem:[%s969_s0] sm:$0xff]  ;;  %v53_v4 = vld [vmem:[%s970_s2 + $0x8] sm:$0xff]  ;;  %v17_v10 = vstv %s973_s7  ;;  %vm68_vm0 = vcmask 130048   ;;  %v784_v16 = vmov 0.0   ;;  %vm163_vm4 = vcmask 64512  }
   0x2   :  { %v52_v3 = vld [vmem:[%s970_s2] sm:$0xff]  ;;  %152 = vperm.xlu1 %765, %v50_v2   ;;  %57 = vperm.xlu0 %764, %v50_v2   ;;  %v51_v5 = vld [vmem:[%s969_s0 + $0x8] sm:$0xff]  ;;  %18 = vst [vmem:[#allocation2] sm:$0x1] %v17_v10  ;;  %v55_v13 = vand.u32 127, %v54_v12  ;;  %v785_v27 = vmov 32  }
   0x3   :  { %v742_v6 = vpack.c.bf16 %v53_v4, %v52_v3  ;;  %v150_v8 = vld [vmem:[%s971_s3] sm:$0xff]  ;;  %v395_v53 = vshrl.u32 %v54_v12, 7  ;;  %vm47_vm10 = vcmask 261120   ;;  %v501_v58 = vld [vmem:[%s975_s5 + $0x8] sm:$0xff]  ;;  %v516_v10 = vld [vmem:[%s978_s8 + $0x10] sm:$0xff] }
   0x4   :  { %v245_v9 = vld [vmem:[%s972_s4] sm:$0xff]  ;;  %49 = vst.msk [vmem:[%s976_s12 + $0x8] sm:$0xff] %vm47_vm10, %v784_v16  ;;  %48 = vst.msk [vmem:[%s976_s12] sm:$0xff] %vm47_vm10, %v784_v16  ;;  %v517_v12 = vld [vmem:[%s978_s8 + $0x18] sm:$0xff] }
   0x5   :  { %743 = vmatprep.subr.bf16.mxu0 %v742_v6  ;;  %719 = vmatprep.subr.mxu1 %v245_v9  ;;  %v677_v54 = vld [vmem:[%s974_s1] ss:$0 sm:$0xff]  ;;  %v396_v55 = vadd.s32 8, %v395_v53 }
   0x6   :  { %766 = vset.pattern.permute.xlu1 %v782_v7  ;;  %60 = vperm.xlu0 %764, %v51_v5   ;;  %vm401_vm8 = vcmp.eq.s32.totalorder %v677_v54, %v395_v53  ;;  %v500_v57 = vld [vmem:[%s975_s5] sm:$0xff] }
   0x7   :  { %247 = vperm.xlu1 %766, %v50_v2   ;;  %745 = vmatpush3.bf16.msra.mxu0 %v742_v6  ;;  %vm402_vm9 = vcmp.eq.s32.totalorder %v677_v54, %v396_v55  ;;  %v678_v56 = vsel %vm401_vm8, 1.0, %v784_v16  ;;  %v675_v59 = vld [vmem:[%s977_s6] ss:$0 sm:$0xff] }
   0x8   :  { %714 = vmatprep.subr.mxu0 %v150_v8  ;;  %720 = vmatpush3.msra.mxu1 %v245_v9  ;;  %v679_v7 = vsel %vm402_vm9, 1.0, %v784_v16  ;;  %v515_v9 = vld [vmem:[%s978_s8 + $0x8] sm:$0xff]  ;;  %v685_v54 = vld [vmem:[%s980_s10] ss:$0 sm:$0xff] }
   0x9   :  { %v676_v11 = vld [vmem:[#allocation2] ss:$0 sm:$0xff] }
   0xa   :  { %767 = vset.pattern.permute.xlu0 %v780_v0 }
   0xb   :  { %250 = vperm.xlu1 %766, %v51_v5   ;;  %155 = vperm.xlu0 %767, %v51_v5  }
   0xf   :  { %366 = vrot.lane.b32.xlu1 %v676_v11, %s783_s15  ;;  %768 = vset.pattern.permute.xlu0 %v785_v27 }
  0x10   :  { %769 = vset.pattern.permute.xlu1 %v785_v27 }
  0x81   :  { %v153_v14 = vpop.permute.xlu1 %152  ;;  %v58_v15 = vpop.permute.xlu0 %57 }
  0x82   :  { %vm62_vm1 = vcmp.eq.s32.totalorder %v58_v15, %v55_v13  ;;  %vm157_vm2 = vcmp.eq.s32.totalorder %v153_v14, %v55_v13  ;;  %v408_v14 = vld [vmem:[%s976_s12 + $0x8] sm:$0xff]  ;;  %v407_v15 = vld [vmem:[%s976_s12] sm:$0xff] }
  0x83   :  { %v663_v17 = vsel %vm62_vm1, 1.0, %v784_v16  ;;  %v667_v21 = vsel %vm157_vm2, 1.0, %v784_v16 }
  0x84   :  { %711 = vmatprep.mubr.msk.f32.mxu0 %vm68_vm0, %v663_v17 }
  0x85   :  { %v61_v18 = vpop.permute.xlu0 %60 }
  0x86   :  { %vm63_vm3 = vcmp.eq.s32.totalorder %v61_v18, %v55_v13  ;;  %v248_v19 = vpop.permute.xlu1 %247 }
  0x87   :  { %v664_v20 = vsel %vm63_vm3, 1.0, %v784_v16  ;;  %vm252_vm5 = vcmp.eq.s32.totalorder %v248_v19, %v55_v13 }
  0x88   :  { %712 = vmatmul.mubr.msk.f32.vlgmr.msra.gmra.mrb[0].mxu0 %vm68_vm0, %v664_v20  ;;  %v671_v22 = vsel %vm252_vm5, 1.0, %v784_v16 }
  0x89   :  { %716 = vmatprep.mubr.msk.f32.mxu0 %vm163_vm4, %v667_v21  ;;  %721 = vmatprep.mubr.msk.f32.mxu1 %vm163_vm4, %v671_v22 }
  0x8a   :  { %v251_v23 = vpop.permute.xlu1 %250  ;;  %715 = vmatpush3.msra.mxu0 %v150_v8  ;;  %v156_v24 = vpop.permute.xlu0 %155  ;;  %v514_v8 = vld [vmem:[%s978_s8] sm:$0xff] }
  0x8b   :  { %vm253_vm6 = vcmp.eq.s32.totalorder %v251_v23, %v55_v13  ;;  %vm158_vm7 = vcmp.eq.s32.totalorder %v156_v24, %v55_v13  ;;  %v750_v11 = vpack.c.bf16 %v515_v9, %v514_v8  ;;  %v754_v13 = vpack.c.bf16 %v517_v12, %v516_v10 }
  0x8c   :  { %v672_v25 = vsel %vm253_vm6, 1.0, %v784_v16  ;;  %v668_v26 = vsel %vm158_vm7, 1.0, %v784_v16 }
  0x8d   :  { %717 = vmatmul.mubr.msk.f32.vlgmr.msra.gmra.mrb[2].mxu0 %vm163_vm4, %v668_v26  ;;  %722 = vmatmul.mubr.msk.f32.vlgmr.msra.gmra.mrb[0].mxu1 %vm163_vm4, %v672_v25  ;;  %v682_v26 = vld [vmem:[%s979_s9] ss:$0 sm:$0xff] }
  0x8e   :  { %v367_v30 = vpop.permute.xlu1 %366  ;;  %728 = vmatprep.mubr.msk.f32.mxu0 %vm68_vm0, %v678_v56  ;;  %751 = vmatprep.subr.bf16.mxu1 %v750_v11 }
  0x8f   :  { %753 = vmatpush3.bf16.msra.mxu1 %v750_v11 }
  0x90   :  { %755 = vmatprep.subr.bf16.mxu1 %v754_v13 }
  0x93   :  { %757 = vmatpush3.bf16.msra.mxu1 %v754_v13 }
 0x15b   :  { %v713_v28 = vpop.f32.mrb[0].mxu0 }
 0x15c   :  { %v141_v29 = vpop.f32.mrb[1].mxu0 }
 0x160   :  { %v718_v31 = vpop.f32.mrb[2].mxu0  ;;  %v723_v32 = vpop.f32.mrb[0].mxu1 }
 0x161   :  { %v340_v33 = vadd.f32 %v718_v31, %v713_v28  ;;  %v359_v34 = vadd.f32 %v723_v32, %v718_v31  ;;  %v236_v35 = vpop.f32.mrb[3].mxu0  ;;  %v330_v36 = vpop.f32.mrb[1].mxu1 }
 0x162   :  { %v339_v37 = vadd.f32 %v236_v35, %v141_v29  ;;  %v358_v38 = vadd.f32 %v330_v36, %v236_v35 }
 0x163   :  { %v342_v39 = vadd.f32 %v723_v32, %v340_v33  ;;  %v370_v40 = vadd.f32 %v367_v30, %v359_v34 }
 0x164   :  { %v341_v41 = vadd.f32 %v339_v37, %v330_v36  ;;  %v369_v42 = vadd.f32 %v367_v30, %v358_v38 }
 0x165   :  { %v372_v43 = vmul.f32 0.5, %v370_v40  ;;  %v351_v60 = vadd.f32 %v675_v59, %v342_v39 }
 0x166   :  { %v371_v44 = vmul.f32 0.5, %v369_v42  ;;  %v350_v61 = vadd.f32 %v675_v59, %v341_v41 }
 0x167   :  { %772 = vtanh.f32 %v372_v43  ;;  %v355_v62 = vmul.f32 0.22916667, %v351_v60  ;;  %vm353_vm11 = vcmp.ge.f32.partialorder %v351_v60, 0.0 }
 0x168   :  { %774 = vtanh.f32 %v371_v44  ;;  %v354_v63 = vmul.f32 0.22916667, %v350_v61  ;;  %vm352_vm12 = vcmp.ge.f32.partialorder %v350_v61, 0.0 }
 0x16a   :  { %v356_v4 = vsel %vm352_vm12, %v350_v61, %v354_v63 }
 0x171   :  { %v773_v45 = vpop.eup %772 }
 0x172   :  { %v775_v46 = vpop.eup %774  ;;  %v376_v47 = vadd.f32 1.0, %v773_v45 }
 0x173   :  { %v375_v48 = vadd.f32 1.0, %v775_v46 }
 0x174   :  { %v378_v49 = vmul.f32 0.5, %v376_v47 }
 0x175   :  { %v377_v50 = vmul.f32 0.5, %v375_v48 }
 0x176   :  { %v380_v51 = vmul.f32 %v713_v28, %v378_v49 }
 0x177   :  { %v379_v52 = vmul.f32 %v377_v50, %v141_v29 }
 0x178   :  { %388 = vperm.xlu1 %769, %v380_v51  }
 0x179   :  { %383 = vperm.xlu0 %768, %v379_v52  }
 0x17c   :  { %770 = vset.pattern.permute.xlu1 %v781_v1 }
 0x17d   :  { %771 = vset.pattern.permute.xlu0 %v781_v1  ;;  %504 = vperm.xlu1 %770, %v500_v57   ;;  %v357_v1 = vsel %vm353_vm11, %v351_v60, %v355_v62  ;;  %v686_v57 = vld [vmem:[%s981_s11] ss:$0 sm:$0xff] }
 0x17e   :  { %509 = vperm.xlu0 %771, %v501_v58  }
 0x1f7   :  { %v389_v0 = vpop.permute.xlu1 %388 }
 0x1f8   :  { %v392_v2 = vmul.f32 %v389_v0, %v357_v1  ;;  %v384_v3 = vpop.permute.xlu0 %383 }
 0x1f9   :  { %v391_v5 = vmul.f32 %v384_v3, %v356_v4 }
 0x1fb   :  { %v746_v6 = vpack.c.bf16 %v392_v2, %v391_v5 }
 0x1fc   :  { %v505_v20 = vpop.permute.xlu1 %504 }
 0x1fd   :  { %747 = vmatprep.subr.bf16.mxu0 %v746_v6  ;;  %v510_v21 = vpop.permute.xlu0 %509 }
 0x1fe   :  { %749 = vmatpush3.bf16.msra.mxu0 %v746_v6 }
 0x201   :  { %729 = vmatmul.mubr.msk.f32.vlgmr.msra.gmra.mrb[4].mxu0 %vm68_vm0, %v679_v7 }
 0x2d4   :  { %v730_v16 = vpop.f32.mrb[4].mxu0 }
 0x2d5   :  { %v491_v17 = vadd.f32 %v730_v16, %v408_v14  ;;  %v481_v18 = vpop.f32.mrb[5].mxu0 }
 0x2d6   :  { %v490_v19 = vadd.f32 %v481_v18, %v407_v15 }
 0x2d7   :  { %494 = vst.msk [vmem:[%s976_s12 + $0x8] sm:$0xff] %vm47_vm10, %v491_v17 }
 0x2d8   :  { %493 = vst.msk [vmem:[%s976_s12] sm:$0xff] %vm47_vm10, %v490_v19 }
 0x2de   :  { %v499_v22 = vld [vmem:[%s976_s12 + $0x8] sm:$0xff] }
 0x2df   :  { %v498_v23 = vld [vmem:[%s976_s12] sm:$0xff]  ;;  %v513_v25 = vmul.f32 %v510_v21, %v499_v22 }
 0x2e0   :  { %v512_v24 = vmul.f32 %v505_v20, %v498_v23 }
 0x2e2   :  { %739 = vmatprep.mubr.msk.f32.mxu1 %vm47_vm10, %v512_v24 }
 0x2e3   :  { %740 = vmatmul.mubr.msk.f32.vlgmr.msra.gmra.mrb[2].mxu1 %vm47_vm10, %v513_v25 }
 0x3b6   :  { %v741_v27 = vpop.f32.mrb[2].mxu1 }
 0x3b7   :  { %v603_v28 = vadd.f32 %v741_v27, %v682_v26  ;;  %v597_v29 = vpop.f32.mrb[3].mxu1 }
 0x3b8   :  { %v598_v30 = vadd.f32 %v682_v26, %v597_v29 }
 0x3b9   :  { %v609_v31 = vmul.f32 0.22916667, %v603_v28  ;;  %vm607_vm13 = vcmp.ge.f32.partialorder %v603_v28, 0.0 }
 0x3ba   :  { %v608_v32 = vmul.f32 0.22916667, %v598_v30  ;;  %vm606_vm14 = vcmp.ge.f32.partialorder %v598_v30, 0.0 }
 0x3bb   :  { %v611_v33 = vsel %vm607_vm13, %v603_v28, %v609_v31 }
 0x3bc   :  { %v617_v34 = vsel %vm47_vm10, %v611_v33, 0.0  ;;  %v610_v35 = vsel %vm606_vm14, %v598_v30, %v608_v32 }
 0x3bd   :  { %618 = vadd.xlane.f32.xlu0 %v617_v34  ;;  %v614_v36 = vsel %vm47_vm10, %v610_v35, 0.0 }
 0x3be   :  { %615 = vadd.xlane.f32.xlu1 %v614_v36 }
 0x44a   :  { %v619_v37 = vpop.xlane.xlu0 %618 }
 0x44b   :  { %v622_v38 = vmul.f32 0.03125, %v619_v37  ;;  %v616_v39 = vpop.xlane.xlu1 %615 }
 0x44c   :  { %v621_v40 = vmul.f32 0.03125, %v616_v39 }
 0x44d   :  { %v624_v41 = vsub.f32 %v611_v33, %v622_v38 }
 0x44e   :  { %v623_v42 = vsub.f32 %v610_v35, %v621_v40 }
 0x44f   :  { %v626_v43 = vmul.f32 %v624_v41, %v624_v41 }
 0x450   :  { %v625_v44 = vmul.f32 %v623_v42, %v623_v42 }
 0x451   :  { %v630_v45 = vsel %vm47_vm10, %v626_v43, 0.0 }
 0x452   :  { %631 = vadd.xlane.f32.xlu0 %v630_v45  ;;  %v627_v46 = vsel %vm47_vm10, %v625_v44, 0.0 }
 0x453   :  { %628 = vadd.xlane.f32.xlu1 %v627_v46 }
 0x4df   :  { %v632_v47 = vpop.xlane.xlu0 %631 }
 0x4e0   :  { %v634_v48 = vmul.f32 0.03125, %v632_v47  ;;  %v629_v49 = vpop.xlane.xlu1 %628 }
 0x4e1   :  { %v633_v50 = vmul.f32 0.03125, %v629_v49 }
 0x4e2   :  { %v636_v51 = vadd.f32 1e-05, %v634_v48 }
 0x4e3   :  { %v635_v52 = vadd.f32 1e-05, %v633_v50 }
 0x4e4   :  { %776 = vrsqrt.f32 %v636_v51 }
 0x4e5   :  { %778 = vrsqrt.f32 %v635_v52 }
 0x4ee   :  { %v777_v53 = vpop.eup %776 }
 0x4ef   :  { %v779_v55 = vpop.eup %778  ;;  %v640_v56 = vmul.f32 %v777_v53, %v624_v41 }
 0x4f0   :  { %v639_v58 = vmul.f32 %v779_v55, %v623_v42 }
 0x4f1   :  { %v648_v59 = vmul.f32 %v685_v54, %v640_v56 }
 0x4f2   :  { %v647_v60 = vmul.f32 %v685_v54, %v639_v58 }
 0x4f3   :  { %v656_v61 = vadd.f32 %v686_v57, %v648_v59 }
 0x4f4   :  { %v655_v62 = vadd.f32 %v686_v57, %v647_v60 }
 0x4f5   :  { %658 = vst.msk [vmem:[%s976_s12 + $0x8] sm:$0xff] %vm47_vm10, %v656_v61 }
 0x4f6   :  { %657 = vst.msk [vmem:[%s976_s12] sm:$0xff] %vm47_vm10, %v655_v62 }

// kernel: prompt_encoder_forward.6
= control target key start
LH: loop header
LB: loop body
LE: loop exit
PB: predicated region body
PF: predicated region fallthrough
CT: control target
= control target key end

     0   :  { %v836_v0 = vmov 3   ;;  %v837_v1 = vmov 2   ;;  %v838_v5 = vmov 1   ;;  %v839_v6 = vmov 0   ;;  %s841_s21 = smov 96   ;;  %s1015_s0 = inlined_call_operand.vmem [shape: s32[16,4], index: 0, kind: input, shape index: {}]   ;;  %s1016_s4 = inlined_call_operand.vmem [shape: f32[8,33], index: 4, kind: input, shape index: {}]   ;;  %s1017_s5 = inlined_call_operand.vmem [shape: f32[8,8], index: 5, kind: input, shape index: {}]   ;;  %s1018_s3 = inlined_call_operand.vmem [shape: f32[16,32], index: 3, kind: input, shape index: {}]   ;;  %s1019_s2 = inlined_call_operand.vmem [shape: f32[16,32], index: 2, kind: input, shape index: {}]   ;;  %s1020_s8 = inlined_call_operand.<no memory space> [shape: f32[1,1], index: 8, kind: input, shape index: {}]   ;;  %s1021_s13 = inlined_call_operand.vmem [shape: f32[8,32], index: 13, kind: output, shape index: {}]   ;;  %s1022_s7 = inlined_call_operand.vmem [shape: f32[1,32], index: 7, kind: input, shape index: {}]   ;;  %s1023_s1 = inlined_call_operand.vmem [shape: s32[1,16], index: 1, kind: input, shape index: {}]   ;;  %s1024_s9 = inlined_call_operand.vmem [shape: f32[32,32], index: 9, kind: input, shape index: {}]   ;;  %s1025_s10 = inlined_call_operand.vmem [shape: f32[1,32], index: 10, kind: input, shape index: {}]   ;;  %s1026_s6 = inlined_call_operand.vmem [shape: f32[8,32], index: 6, kind: input, shape index: {}]   ;;  %s1027_s11 = inlined_call_operand.vmem [shape: f32[1,32], index: 11, kind: input, shape index: {}]   ;;  %s1028_s12 = inlined_call_operand.vmem [shape: f32[1,32], index: 12, kind: input, shape index: {}]  }
   0x1   :  { %824 = vset.pattern.permute.xlu1 %v836_v0  ;;  %823 = vset.pattern.permute.xlu0 %v837_v1  ;;  %v52_v2 = vld [vmem:[%s1015_s0] sm:$0xff]  ;;  %v53_v3 = vld [vmem:[%s1015_s0 + $0x8] sm:$0xff]  ;;  %v56_v11 = vlaneseq  ;;  %vm179_vm0 = vcmask 64512   ;;  %v840_v15 = vmov 0.0   ;;  %vm84_vm5 = vcmask 130048  }
   0x2   :  { %263 = vperm.xlu1 %824, %v52_v2   ;;  %168 = vperm.xlu0 %823, %v52_v2   ;;  %v166_v4 = vld [vmem:[%s1016_s4] sm:$0xff]  ;;  %v71_v9 = vld [vmem:[%s1018_s3 + $0x8] sm:$0xff]  ;;  %v18_v33 = vstv %s1020_s8  ;;  %v842_v61 = vmov 0.0|0.0   ;;  %vm843_vm10 = vmmov 0   ;;  %vm50_vm11 = vcmask 261120  }
   0x3   :  { %761 = vmatprep.subr.mxu1 %v166_v4  ;;  %v261_v7 = vld [vmem:[%s1017_s5] sm:$0xff]  ;;  %v57_v12 = vand.u32 127, %v56_v11  ;;  %v55_v18 = vld [vmem:[%s1019_s2 + $0x8] sm:$0xff]  ;;  %19 = vst [vmem:[#allocation2] sm:$0x1] %v18_v33  ;;  %51 = vst.msk [vmem:[%s1021_s13] sm:$0xff] %vm50_vm11, %v840_v15 }
   0x4   :  { %762 = vmatpush3.msra.mxu1 %v166_v4  ;;  %v70_v8 = vld [vmem:[%s1018_s3] sm:$0xff]  ;;  %v494_v4 = vshrl.u32 %v56_v11, 7 }
   0x5   :  { %766 = vmatprep.subr.mxu1 %v261_v7  ;;  %v796_v10 = vpack.c.bf16 %v71_v9, %v70_v8  ;;  %v54_v17 = vld [vmem:[%s1019_s2] sm:$0xff] }
   0x6   :  { %266 = vperm.xlu1 %824, %v53_v3   ;;  %171 = vperm.xlu0 %823, %v53_v3   ;;  %v800_v22 = vpack.c.bf16 %v55_v18, %v54_v17  ;;  %v723_v62 = vld [vmem:[%s1022_s7] ss:$0 sm:$0xff]  ;;  %v585_v17 = vld [vmem:[%s1024_s9 + $0x10] sm:$0xff]  ;;  %v586_v18 = vld [vmem:[%s1024_s9 + $0x18] sm:$0xff] }
   0x7   :  { %797 = vmatprep.subr.bf16.mxu0 %v796_v10  ;;  %v583_v11 = vld [vmem:[%s1024_s9] sm:$0xff] }
   0x8   :  { %799 = vmatpush3.bf16.msra.mxu0 %v796_v10 }
   0x9   :  { %807 = vmatprep.subr.bf16.mxu0 %v842_v61 }
   0xa   :  { %826 = vset.pattern.permute.xlu1 %v838_v5  ;;  %825 = vset.pattern.permute.xlu0 %v839_v6  ;;  %v724_v46 = vld [vmem:[#allocation2] ss:$0 sm:$0xff] }
   0xb   :  { %73 = vperm.xlu1 %826, %v52_v2   ;;  %59 = vperm.xlu0 %825, %v52_v2  }
   0xf   :  { %827 = vset.pattern.permute.xlu1 %v839_v6  ;;  %828 = vset.pattern.permute.xlu0 %v838_v5  ;;  %v725_v5 = vld [vmem:[%s1023_s1] ss:$0 sm:$0xff] }
  0x10   :  { %62 = vperm.xlu1 %827, %v53_v3   ;;  %76 = vperm.xlu0 %828, %v53_v3   ;;  %vm499_vm14 = vcmp.eq.s32.totalorder %v725_v5, %v494_v4 }
  0x14   :  { %829 = vset.pattern.permute.xlu0 %v839_v6 }
  0x81   :  { %v169_v13 = vpop.permute.xlu0 %168  ;;  %v264_v14 = vpop.permute.xlu1 %263 }
  0x82   :  { %vm173_vm1 = vcmp.eq.s32.totalorder %v169_v13, %v57_v12  ;;  %vm268_vm2 = vcmp.eq.s32.totalorder %v264_v14, %v57_v12  ;;  %v726_v13 = vsel %vm499_vm14, 1.0, %v840_v15  ;;  %v584_v14 = vld [vmem:[%s1024_s9 + $0x8] sm:$0xff] }
  0x83   :  { %v713_v16 = vsel %vm173_vm1, 1.0, %v840_v15  ;;  %v717_v21 = vsel %vm268_vm2, 1.0, %v840_v15 }
  0x84   :  { %763 = vmatprep.mubr.msk.f32.mxu1 %vm179_vm0, %v713_v16  ;;  %v808_v16 = vpack.c.bf16 %v584_v14, %v583_v11 }
  0x85   :  { %v172_v19 = vpop.permute.xlu0 %171  ;;  %v267_v20 = vpop.permute.xlu1 %266 }
  0x86   :  { %vm174_vm3 = vcmp.eq.s32.totalorder %v172_v19, %v57_v12  ;;  %vm269_vm4 = vcmp.eq.s32.totalorder %v267_v20, %v57_v12  ;;  %v502_v19 = vld [vmem:[%s1021_s13] sm:$0xff] }
  0x87   :  { %v714_v23 = vsel %vm174_vm3, 1.0, %v840_v15  ;;  %v718_v24 = vsel %vm269_vm4, 1.0, %v840_v15 }
  0x88   :  { %764 = vmatmul.mubr.msk.f32.vlgmr.msra.gmra.mrb[0].mxu1 %vm179_vm0, %v714_v23 }
  0x89   :  { %767 = vmatpush3.msra.mxu1 %v261_v7  ;;  %768 = vmatprep.mubr.msk.f32.mxu1 %vm179_vm0, %v717_v21 }
  0x8a   :  { %v74_v25 = vpop.permute.xlu1 %73  ;;  %v60_v26 = vpop.permute.xlu0 %59  ;;  %801 = vmatprep.subr.bf16.mxu1 %v800_v22 }
  0x8b   :  { %vm78_vm6 = vcmp.eq.s32.totalorder %v74_v25, %v57_v12  ;;  %vm64_vm7 = vcmp.eq.s32.totalorder %v60_v26, %v57_v12 }
  0x8c   :  { %v707_v27 = vsel %vm64_vm7, 1.0, %v840_v15  ;;  %769 = vmatmul.mubr.msk.f32.vlgmr.msra.gmra.mrb[2].mxu1 %vm179_vm0, %v718_v24  ;;  %v709_v28 = vsel %vm78_vm6, 1.0, %v840_v15  ;;  %v728_v24 = vld [vmem:[%s1025_s10] ss:$0 sm:$0xff] }
  0x8d   :  { %803 = vmatpush3.bf16.msra.mxu1 %v800_v22  ;;  %758 = vmatprep.mubr.msk.f32.mxu0 %vm84_vm5, %v709_v28 }
  0x8e   :  { %775 = vmatprep.mubr.msk.f32.mxu1 %vm84_vm5, %v707_v27  ;;  %804 = vmatprep.subr.bf16.mxu1 %v842_v61 }
  0x8f   :  { %v63_v29 = vpop.permute.xlu1 %62  ;;  %v77_v30 = vpop.permute.xlu0 %76 }
  0x90   :  { %vm65_vm8 = vcmp.eq.s32.totalorder %v63_v29, %v57_v12  ;;  %vm79_vm9 = vcmp.eq.s32.totalorder %v77_v30, %v57_v12  ;;  %v670_v29 = vld [vmem:[%s1026_s6] sm:$0xff] }
  0x91   :  { %v708_v31 = vsel %vm65_vm8, 1.0, %v840_v15  ;;  %v710_v32 = vsel %vm79_vm9, 1.0, %v840_v15 }
  0x92   :  { %759 = vmatmul.mubr.msk.f32.vlgmr.msra.gmra.mrb[0].mxu0 %vm84_vm5, %v710_v32  ;;  %776 = vmatmul.mubr.msk.f32.vlgmr.msra.gmra.mrb[4].mxu1 %vm84_vm5, %v708_v31 }
  0x93   :  { %782 = vmatprep.mubr.msk.f32.mxu1 %vm843_vm10, %v840_v15  ;;  %793 = vmatprep.mubr.msk.f32.mxu0 %vm843_vm10, %v840_v15  ;;  %v811_v15 = vpack.c.bf16 %v586_v18, %v585_v17 }
  0x94   :  { %809 = vmatpush3.bf16.msra.mxu0 %v808_v16 }
  0x95   :  { %810 = vmatprep.subr.bf16.mxu0 %v842_v61 }
  0x98   :  { %812 = vmatpush3.bf16.msra.mxu0 %v811_v15 }
 0x15b   :  { %v765_v34 = vpop.f32.mrb[0].mxu1 }
 0x15c   :  { %v252_v35 = vpop.f32.mrb[1].mxu1 }
 0x15d   :  { %455 = vrot.lane.b32.xlu1 %v252_v35, %s841_s21 }
 0x15f   :  { %v770_v36 = vpop.f32.mrb[2].mxu1 }
 0x160   :  { %v346_v37 = vpop.f32.mrb[3].mxu1 }
 0x161   :  { %457 = vrot.lane.b32.xlu1 %v765_v34, %s841_s21 }
 0x165   :  { %v760_v38 = vpop.f32.mrb[0].mxu0  ;;  %v777_v39 = vpop.f32.mrb[4].mxu1 }
 0x166   :  { %v433_v40 = vadd.f32 %v777_v39, %v760_v38  ;;  %v157_v41 = vpop.f32.mrb[1].mxu0  ;;  %v427_v42 = vpop.f32.mrb[5].mxu1 }
 0x167   :  { %v428_v43 = vadd.f32 %v427_v42, %v157_v41  ;;  %v730_v42 = vld [vmem:[%s1027_s11] ss:$0 sm:$0xff] }
 0x168   :  { %v437_v44 = vadd.f32 %v765_v34, %v433_v40 }
 0x169   :  { %v436_v45 = vadd.f32 %v428_v43, %v252_v35 }
 0x16a   :  { %v446_v63 = vadd.f32 %v723_v62, %v437_v44  ;;  %v731_v44 = vld [vmem:[%s1028_s12] ss:$0 sm:$0xff] }
 0x16b   :  { %v445_v0 = vadd.f32 %v723_v62, %v436_v45 }
 0x16c   :  { %v450_v2 = vmul.f32 0.22916667, %v446_v63  ;;  %vm448_vm13 = vcmp.ge.f32.partialorder %v446_v63, 0.0 }
 0x16d   :  { %v449_v1 = vmul.f32 0.22916667, %v445_v0  ;;  %vm447_vm12 = vcmp.ge.f32.partialorder %v445_v0, 0.0 }
 0x16e   :  { %v452_v8 = vsel %vm448_vm13, %v446_v63, %v450_v2 }
 0x16f   :  { %v451_v6 = vsel %vm447_vm12, %v445_v0, %v449_v1 }
 0x1cf   :  { %v456_v47 = vpop.permute.xlu1 %455 }
 0x1d0   :  { %v461_v48 = vadd.f32 %v456_v47, %v346_v37 }
 0x1d2   :  { %v470_v49 = vadd.f32 %v724_v46, %v461_v48 }
 0x1d3   :  { %v458_v50 = vpop.permute.xlu1 %457 }
 0x1d4   :  { %v472_v51 = vmul.f32 0.5, %v470_v49  ;;  %v462_v52 = vadd.f32 %v770_v36, %v458_v50 }
 0x1d6   :  { %830 = vtanh.f32 %v472_v51  ;;  %v471_v53 = vadd.f32 %v724_v46, %v462_v52 }
 0x1d8   :  { %v473_v54 = vmul.f32 0.5, %v471_v53 }
 0x1da   :  { %832 = vtanh.f32 %v473_v54 }
 0x1e0   :  { %v831_v55 = vpop.eup %830 }
 0x1e1   :  { %v476_v56 = vadd.f32 1.0, %v831_v55 }
 0x1e3   :  { %v478_v57 = vmul.f32 0.5, %v476_v56 }
 0x1e4   :  { %v833_v58 = vpop.eup %832 }
 0x1e5   :  { %482 = vperm.xlu0 %829, %v478_v57   ;;  %v477_v59 = vadd.f32 1.0, %v833_v58 }
 0x1e7   :  { %v479_v60 = vmul.f32 0.5, %v477_v59 }
 0x1e9   :  { %487 = vperm.xlu1 %827, %v479_v60  }
 0x264   :  { %v483_v3 = vpop.permute.xlu0 %482 }
 0x265   :  { %v490_v9 = vmul.f32 %v483_v3, %v451_v6 }
 0x268   :  { %v488_v7 = vpop.permute.xlu1 %487 }
 0x269   :  { %v491_v10 = vmul.f32 %v488_v7, %v452_v8 }
 0x26b   :  { %v805_v12 = vpack.c.bf16 %v491_v10, %v490_v9 }
 0x26d   :  { %806 = vmatpush3.bf16.msra.mxu1 %v805_v12 }
 0x270   :  { %783 = vmatmul.mubr.msk.f32.vlgmr.msra.gmra.mrb[6].mxu1 %vm84_vm5, %v726_v13 }
 0x343   :  { %v572_v20 = vpop.f32.mrb[6].mxu1 }
 0x344   :  { %v576_v21 = vadd.f32 %v572_v20, %v502_v19  ;;  %v784_v22 = vpop.f32.mrb[7].mxu1 }
 0x346   :  { %578 = vst.msk [vmem:[%s1021_s13] sm:$0xff] %vm50_vm11, %v576_v21 }
 0x34d   :  { %v582_v23 = vld [vmem:[%s1021_s13] sm:$0xff] }
 0x34e   :  { %794 = vmatmul.mubr.msk.f32.vlgmr.msra.gmra.mrb[2].mxu0 %vm50_vm11, %v582_v23 }
 0x421   :  { %v663_v25 = vpop.f32.mrb[2].mxu0 }
 0x422   :  { %v664_v26 = vadd.f32 %v728_v24, %v663_v25  ;;  %v795_v27 = vpop.f32.mrb[3].mxu0 }
 0x424   :  { %vm667_vm15 = vcmp.ge.f32.partialorder %v664_v26, 0.0  ;;  %v668_v28 = vmul.f32 0.22916667, %v664_v26 }
 0x426   :  { %v669_v30 = vsel %vm667_vm15, %v664_v26, %v668_v28 }
 0x427   :  { %v671_v31 = vadd.f32 %v670_v29, %v669_v30 }
 0x429   :  { %v674_v32 = vsel %vm50_vm11, %v671_v31, 0.0 }
 0x42a   :  { %675 = vadd.xlane.f32.xlu1 %v674_v32 }
 0x4b7   :  { %v676_v33 = vpop.xlane.xlu1 %675 }
 0x4b8   :  { %v678_v34 = vmul.f32 0.03125, %v676_v33 }
 0x4ba   :  { %v679_v35 = vsub.f32 %v671_v31, %v678_v34 }
 0x4bc   :  { %v680_v36 = vmul.f32 %v679_v35, %v679_v35 }
 0x4be   :  { %v681_v37 = vsel %vm50_vm11, %v680_v36, 0.0 }
 0x4bf   :  { %682 = vadd.xlane.f32.xlu0 %v681_v37 }
 0x54c   :  { %v683_v38 = vpop.xlane.xlu0 %682 }
 0x54d   :  { %v684_v39 = vmul.f32 0.03125, %v683_v38 }
 0x54f   :  { %v685_v40 = vadd.f32 1e-05, %v684_v39 }
 0x551   :  { %834 = vrsqrt.f32 %v685_v40 }
 0x55b   :  { %v835_v41 = vpop.eup %834 }
 0x55c   :  { %v687_v43 = vmul.f32 %v835_v41, %v679_v35 }
 0x55e   :  { %v694_v45 = vmul.f32 %v730_v42, %v687_v43 }
 0x560   :  { %v701_v46 = vadd.f32 %v731_v44, %v694_v45 }
 0x562   :  { %702 = vst.msk [vmem:[%s1021_s13] sm:$0xff] %vm50_vm11, %v701_v46 }

</bundles_post_ra>
